<compile_context>
chip_gen: v7x
topology: tpu7x:2x2x1
jax: 0.10.0
libtpu: 0.0.40
codegen_flags: <defaults>
</compile_context>

<pallas_src>
import functools

import jax
import jax.numpy as jnp
from jax import lax
from jax.experimental import pallas as pl
from jax.experimental.pallas import tpu as pltpu


# ------------------------------------------------------------------ VMEM budgeting / tiling
def _vmem_limit_bytes():
    """Explicit scoped-VMEM limit with headroom (~<=100 MiB on v5e/v6e, ~56 MiB on v7x)."""
    cap = 128 * (1 << 20)
    try:
        cap = int(getattr(pltpu.get_tpu_info(), "vmem_capacity_bytes", cap))
    except Exception:
        pass
    return int(min(cap - cap // 8, 100 * (1 << 20)))


def _aligned_tile_start(W):
    """First 128-aligned column >= W + 1 (where the row tile starts inside the staged buffer)."""
    return -(-(W + 1) // 128) * 128


def _working_set_bytes(cin, chid, nc, W, th):
    """Conservative per-grid-step VMEM working-set estimate for a row tile of `th` image rows."""
    ts = th * W
    xcols = _aligned_tile_start(W) + ts + W + 1
    b = 0
    b += 2 * cin * ts * 2                    # x row-tile block, double buffered (bf16)
    b += 2 * cin * 2 * W * 2                 # halo block, double buffered (bf16)
    b += 2 * nc * ts * 4                     # output block, double buffered (f32)
    b += cin * xcols * 2                     # staged (halo | tile | halo) scratch (bf16)
    b += 2 * cin * xcols * 2                 # hoisted left/right masked copies (bf16)
    b += 2 * cin * ts * 2                    # live shifted tap operands (headroom)
    b += 2 * chid * ts * 4                   # f32 conv1 accumulator + conv2 result
    b += 2 * chid * ts * 2                   # bf16 hidden activations
    b += 2 * nc * ts * 4                     # logits / sigmoid
    b += 2 * 2 * (chid * 9 * cin + chid * chid + nc * chid)   # bf16 weights (double buffered)
    b += 2 * 4 * (2 * chid + nc)             # f32 biases
    return b


def _pick_tile_h(H, W, cin, chid, nc, budget):
    """LARGEST row tile TH with H % TH == 0, (TH*W) % 128 == 0 (or TH == H), fitting `budget`."""
    legal = [th for th in range(H, 0, -1)
             if H % th == 0 and ((th * W) % 128 == 0 or th == H)]
    for th in legal:                         # largest first
        if _working_set_bytes(cin, chid, nc, W, th) <= budget:
            return th
    return legal[-1]                         # nothing fits: smallest legal tile


# ------------------------------------------------------------------ kernel
def bev_head_kernel(x_ref, halo_ref, w1_ref, b1_ref, w2_ref, b2_ref, wc_ref, bc_ref,
                    o_ref, xpad_ref, *, W, C0):
    # x_ref    : (Cin, TILE_S)   bf16 row tile (NCHW, flattened spatial), auto-pipelined
    # halo_ref : (Cin, 2*W)      bf16 [row above tile | row below tile], zeros at image edges
    # w1_ref   : (Chid, 9*Cin)   bf16 block-diag dense grouped 3x3 conv, BN1 scale folded
    # b1_ref   : (Chid, 1)       f32 folded BN1 bias
    # w2_ref   : (Chid, Chid)    bf16 1x1 conv, BN2 scale folded;  b2_ref: (Chid, 1) f32
    # wc_ref   : (NC, Chid)      bf16 classifier;                  bc_ref: (NC, 1)   f32
    # o_ref    : (NC, TILE_S)    f32 sigmoid(logits), lane-dense
    # xpad_ref : (Cin, C0 + TILE_S + W + 1) bf16 scratch: [dead | top halo | tile | bot halo | 1]
    cin, tile_s = x_ref.shape
    ncols = xpad_ref.shape[1]

    # --- stage halos + tile (no zero-fill needed: boundary halos arrive pre-zeroed, and the two
    #     never-written pad columns are only ever read through the edge masks below) ---
    xpad_ref[:, C0 - W:C0] = halo_ref[:, :W]                      # row above the tile
    xpad_ref[:, C0:C0 + tile_s] = x_ref[...]                      # lane-aligned bulk store
    xpad_ref[:, C0 + tile_s:C0 + tile_s + W] = halo_ref[:, W:]    # row below the tile

    # --- hoisted left/right image-edge masks: 2 selects total (vs 6 per-tap ones) ---
    xpad = xpad_ref[...]
    colp = lax.broadcasted_iota(jnp.int32, (1, ncols), 1) % W
    m_l = jnp.where(colp != (C0 - 1) % W, xpad, jnp.zeros_like(xpad))   # for kx == 0 taps
    m_r = jnp.where(colp != C0 % W, xpad, jnp.zeros_like(xpad))         # for kx == 2 taps

    # --- grouped 3x3 conv as nine accumulated K=Cin bf16 matmuls (f32 acc), no im2col patch ---
    acc = None
    for ky in range(3):
        for kx in range(3):
            src = m_l if kx == 0 else (m_r if kx == 2 else xpad)
            off = C0 + (ky - 1) * W + (kx - 1)
            tap = src[:, off:off + tile_s]                        # (Cin, TILE_S)
            t_idx = ky * 3 + kx
            part = jnp.dot(w1_ref[:, t_idx * cin:(t_idx + 1) * cin], tap,
                           preferred_element_type=jnp.float32)
            acc = part if acc is None else acc + part

    # --- folded-BN bias + ReLU, 1x1 conv + folded-BN bias + ReLU, classifier + sigmoid ---
    h = jnp.maximum(acc + b1_ref[...], 0.0).astype(jnp.bfloat16)
    h = jnp.dot(w2_ref[...], h, preferred_element_type=jnp.float32)
    h = jnp.maximum(h + b2_ref[...], 0.0).astype(jnp.bfloat16)
    logits = jnp.dot(wc_ref[...], h, preferred_element_type=jnp.float32) + bc_ref[...]
    o_ref[...] = jax.nn.sigmoid(logits)


# ------------------------------------------------------------------ wrapper
@functools.partial(jax.jit, static_argnames=("tile_rows",))
def bev_head_forward(x_nchw, w1r, b1, w2f, b2, wc, bc, *, tile_rows=None):
    """Inference forward: sigmoid(classifier(features(x))). Returns (B, NC, H, W) f32 (NCHW)."""
    B, Cin, H, W = x_nchw.shape
    Chid = w1r.shape[0]
    NC = wc.shape[0]
    S = H * W

    vmem_limit = _vmem_limit_bytes()
    if tile_rows is None:
        TH = _pick_tile_h(H, W, Cin, Chid, NC, budget=vmem_limit)
    else:
        TH = int(tile_rows)
        assert H % TH == 0 and ((TH * W) % 128 == 0 or TH == H), (TH, H, W)
    T = H // TH
    TILE_S = TH * W
    C0 = _aligned_tile_start(W)
    XCOLS = C0 + TILE_S + W + 1

    # bf16 feature map (mirrors the module's autocast'ed features); reshape is free.
    x4 = x_nchw.astype(jnp.bfloat16)
    x_flat = x4.reshape(B, Cin, S)

    # Pre-gathered halo rows per row tile: [..., :W] = image row above the tile (zeros for the
    # first tile), [..., W:] = row below (zeros for the last tile).  Layout plumbing in the
    # wrapper; total extra HBM traffic ~= 2/TH of one x read.
    zrow = jnp.zeros((B, Cin, 1, W), jnp.bfloat16)
    if T > 1:
        top = jnp.concatenate([zrow, x4[:, :, TH - 1:H - 1:TH, :]], axis=2)   # (B,Cin,T,W)
        bot = jnp.concatenate([x4[:, :, TH:H:TH, :], zrow], axis=2)           # (B,Cin,T,W)
    else:
        top, bot = zrow, zrow
    halo = jnp.transpose(jnp.concatenate([top, bot], axis=3), (0, 2, 1, 3))   # (B,T,Cin,2W)

    w1r = w1r.astype(jnp.bfloat16)
    w2f = w2f.astype(jnp.bfloat16)
    wc = wc.astype(jnp.bfloat16)
    b1 = b1.astype(jnp.float32)
    b2 = b2.astype(jnp.float32)
    bc = bc.astype(jnp.float32)

    weight_bytes = 2 * (Chid * 9 * Cin + Chid * Chid + NC * Chid) + 4 * (2 * Chid + NC)
    cost = pl.CostEstimate(
        flops=2 * B * S * (9 * Cin * Chid + Chid * Chid + Chid * NC),
        transcendentals=B * NC * S,
        bytes_accessed=(B * Cin * S * 2) + (B * T * Cin * 2 * W * 2)
                       + (B * NC * S * 4) + weight_bytes)

    kernel = functools.partial(bev_head_kernel, W=W, C0=C0)
    out = pl.pallas_call(
        kernel,
        out_shape=jax.ShapeDtypeStruct((B, NC, S), jnp.float32),
        grid=(B, T),
        in_specs=[
            pl.BlockSpec((pl.Squeezed(), Cin, TILE_S), lambda b, t: (b, 0, t)),
            pl.BlockSpec((pl.Squeezed(), pl.Squeezed(), Cin, 2 * W), lambda b, t: (b, t, 0, 0)),
            pl.BlockSpec((Chid, 9 * Cin), lambda b, t: (0, 0)),
            pl.BlockSpec((Chid, 1), lambda b, t: (0, 0)),
            pl.BlockSpec((Chid, Chid), lambda b, t: (0, 0)),
            pl.BlockSpec((Chid, 1), lambda b, t: (0, 0)),
            pl.BlockSpec((NC, Chid), lambda b, t: (0, 0)),
            pl.BlockSpec((NC, 1), lambda b, t: (0, 0)),
        ],
        out_specs=pl.BlockSpec((pl.Squeezed(), NC, TILE_S), lambda b, t: (b, 0, t)),
        scratch_shapes=[
            pltpu.VMEM((Cin, XCOLS), jnp.bfloat16),    # staged [dead | halo | tile | halo | 1]
        ],
        compiler_params=pltpu.CompilerParams(
            # x is row-tiled per t, so splitting either axis across v7x's two cores does not
            # duplicate the image in HBM/VMEM.
            dimension_semantics=("parallel", "parallel"),
            vmem_limit_bytes=vmem_limit),
        cost_estimate=cost,
    )(x_flat, halo, w1r, b1, w2f, b2, wc, bc)

    return out.reshape(B, NC, H, W)   # free reshape; output already NCHW-flattened, lane-dense


# ------------------------------------------------------------------ params
def make_params(key, in_channels, hidden_channels, num_classes, groups=8):
    """Mirror the PyTorch module's _init_weights() + eval-mode BatchNorm, BN folded into weights."""
    k1, k2, k3, k4 = jax.random.split(key, 4)
    cig = in_channels // groups
    cog = hidden_channels // groups

    # Conv1: grouped 3x3, PyTorch weight (Chid, Cin/G, 3, 3), uniform(-1/sqrt(fan_in), +)
    bnd1 = 1.0 / (cig ** 0.5)
    w1_g = jax.random.uniform(k1, (hidden_channels, cig, 3, 3),
                              minval=-bnd1, maxval=bnd1, dtype=jnp.float32)
    # Conv2: 1x1, (O, I), fan_in = hidden
    bnd2 = 1.0 / (hidden_channels ** 0.5)
    w2 = jax.random.uniform(k2, (hidden_channels, hidden_channels),
                            minval=-bnd2, maxval=bnd2, dtype=jnp.float32)
    # Classifier: 1x1 (NC, Chid) weight + bias, same bound
    wc = jax.random.uniform(k3, (num_classes, hidden_channels),
                            minval=-bnd2, maxval=bnd2, dtype=jnp.float32)
    bc = jax.random.uniform(k4, (num_classes, 1),
                            minval=-bnd2, maxval=bnd2, dtype=jnp.float32)

    # BatchNorm eval fold: s = gamma/sqrt(var+eps), b = beta - mean*s (default init/running stats)
    eps = 1e-5
    gamma = jnp.ones((hidden_channels,), jnp.float32)
    beta = jnp.zeros((hidden_channels,), jnp.float32)
    mean = jnp.zeros((hidden_channels,), jnp.float32)
    var = jnp.ones((hidden_channels,), jnp.float32)
    s1 = gamma / jnp.sqrt(var + eps)
    b1 = beta - mean * s1
    s2, b2 = s1, b1

    # Block-diagonal dense (Chid, Cin, 3, 3) with BN1 scale folded into the output channels
    w1_full = jnp.zeros((hidden_channels, in_channels, 3, 3), jnp.float32)
    for g in range(groups):
        w1_full = w1_full.at[g * cog:(g + 1) * cog, g * cig:(g + 1) * cig].set(
            w1_g[g * cog:(g + 1) * cog])
    w1_full = w1_full * s1[:, None, None, None]
    # (Chid, 9*Cin) with column index = (ky*3+kx)*Cin + cin -- matches the kernel tap/weight order
    w1r = jnp.transpose(w1_full, (0, 2, 3, 1)).reshape(hidden_channels, 9 * in_channels)

    w2f = w2 * s2[:, None]   # fold BN2 scale into the 1x1 conv

    params = (w1r.astype(jnp.bfloat16), b1.reshape(-1, 1),
              w2f.astype(jnp.bfloat16), b2.reshape(-1, 1),
              wc.astype(jnp.bfloat16), bc)
    # grouped OIHW weight with BN1 scale folded, for the JAX reference conv
    w1_g_folded = (w1_g * s1[:, None, None, None]).astype(jnp.bfloat16)
    return params, w1_g_folded


# ------------------------------------------------------------------ reference
def reference_forward(x_nchw_bf16, w1_grouped_folded, params, groups=8):
    w1r, b1, w2f, b2, wc, bc = params
    h = lax.conv_general_dilated(
        x_nchw_bf16, w1_grouped_folded, window_strides=(1, 1), padding="SAME",
        dimension_numbers=("NCHW", "OIHW", "NCHW"),
        feature_group_count=groups, preferred_element_type=jnp.float32)
    h = jnp.maximum(h + b1.reshape(1, -1, 1, 1), 0.0).astype(jnp.bfloat16)
    h = jnp.einsum("oc,bchw->bohw", w2f, h, preferred_element_type=jnp.float32)
    h = jnp.maximum(h + b2.reshape(1, -1, 1, 1), 0.0).astype(jnp.bfloat16)
    logits = jnp.einsum("oc,bchw->bohw", wc, h,
                        preferred_element_type=jnp.float32) + bc.reshape(1, -1, 1, 1)
    return jax.nn.sigmoid(logits)


# ------------------------------------------------------------------ main
if __name__ == "__main__":
    B, Cin, Chid, NC, H, W, G = 2, 32, 32, 3, 16, 16, 8

    key = jax.random.PRNGKey(0)
    kx_, kp = jax.random.split(key)
    x = jax.random.normal(kx_, (B, Cin, H, W), dtype=jnp.float32)   # NCHW, like PyTorch

    params, w1_g_folded = make_params(kp, Cin, Chid, NC, groups=G)

    ref = jax.block_until_ready(
        reference_forward(x.astype(jnp.bfloat16), w1_g_folded, params, groups=G))

    # Auto tiling (largest row tile that fits the VMEM budget -> single tile at this size).
    out = jax.block_until_ready(bev_head_forward(x, *params))
    assert out.shape == (B, NC, H, W), out.shape
    err = float(jnp.max(jnp.abs(out - ref)))
    assert err < 1e-2, err

    # Forced multi-tile path (tile_rows=8 -> 2 row tiles) to exercise the halo-row machinery.
    out2 = jax.block_until_ready(bev_head_forward(x, *params, tile_rows=8))
    err2 = float(jnp.max(jnp.abs(out2 - ref)))
    assert err2 < 1e-2, err2

    print("KERNEL_OK")
</pallas_src>

<mosaic_0001>
module attributes {stable_mosaic.version = 11 : i64} {
  func.func @bev_head_kernel(%arg0: i32, %arg1: i32, %arg2: memref<1x32x256xbf16, #tpu.memory_space<vmem>>, %arg3: memref<1x1x32x32xbf16, #tpu.memory_space<vmem>>, %arg4: memref<32x288xbf16, #tpu.memory_space<vmem>>, %arg5: memref<32x1xf32, #tpu.memory_space<vmem>>, %arg6: memref<32x32xbf16, #tpu.memory_space<vmem>>, %arg7: memref<32x1xf32, #tpu.memory_space<vmem>>, %arg8: memref<3x32xbf16, #tpu.memory_space<vmem>>, %arg9: memref<3x1xf32, #tpu.memory_space<vmem>>, %arg10: memref<1x3x256xf32, #tpu.memory_space<vmem>>, %arg11: memref<32x401xbf16, #tpu.memory_space<vmem>>) attributes {dimension_semantics = [#tpu.dimension_semantics<parallel>, #tpu.dimension_semantics<parallel>], iteration_bounds = array<i64: 2, 1>, scalar_prefetch = 0 : i64, scratch_operands = 1 : i64, tpu.core_type = #tpu.core_type<tc>, window_params = [{transform_indices = @transform_0, window_bounds = array<i64: 1, 32, 256>}, {transform_indices = @transform_1, window_bounds = array<i64: 1, 1, 32, 32>}, {pipeline_mode = #tpu.pipeline_mode<synchronous>, transform_indices = @transform_2, window_bounds = array<i64: 32, 288>}, {pipeline_mode = #tpu.pipeline_mode<synchronous>, transform_indices = @transform_3, window_bounds = array<i64: 32, 1>}, {pipeline_mode = #tpu.pipeline_mode<synchronous>, transform_indices = @transform_4, window_bounds = array<i64: 32, 32>}, {pipeline_mode = #tpu.pipeline_mode<synchronous>, transform_indices = @transform_5, window_bounds = array<i64: 32, 1>}, {pipeline_mode = #tpu.pipeline_mode<synchronous>, transform_indices = @transform_6, window_bounds = array<i64: 3, 32>}, {pipeline_mode = #tpu.pipeline_mode<synchronous>, transform_indices = @transform_7, window_bounds = array<i64: 3, 1>}, {transform_indices = @transform_8, window_bounds = array<i64: 1, 3, 256>}]} {
    %c0 = arith.constant 0 : index
    %c0_0 = arith.constant 0 : index
    %c0_1 = arith.constant 0 : index
    %c0_2 = arith.constant 0 : index
    %0 = vector.load %arg3[%c0, %c0_0, %c0_1, %c0_2] : memref<1x1x32x32xbf16, #tpu.memory_space<vmem>>, vector<1x1x32x16xbf16>
    %1 = vector.shape_cast %0 : vector<1x1x32x16xbf16> to vector<32x16xbf16>
    %c0_3 = arith.constant 0 : index
    %c112 = arith.constant 112 : index
    %2 = vector.load %arg11[%c0_3, %c112] : memref<32x401xbf16, #tpu.memory_space<vmem>>, vector<32x16xbf16>
    tpu.vector_store %arg11[%c0_3, %c112], %1 {strides = array<i32>} : memref<32x401xbf16, #tpu.memory_space<vmem>>, vector<32x16xbf16>,
    %c0_4 = arith.constant 0 : index
    %c0_5 = arith.constant 0 : index
    %c0_6 = arith.constant 0 : index
    %3 = vector.load %arg2[%c0_4, %c0_5, %c0_6] : memref<1x32x256xbf16, #tpu.memory_space<vmem>>, vector<1x32x256xbf16>
    %4 = vector.shape_cast %3 : vector<1x32x256xbf16> to vector<32x256xbf16>
    %c0_7 = arith.constant 0 : index
    %c128 = arith.constant 128 : index
    %5 = vector.load %arg11[%c0_7, %c128] : memref<32x401xbf16, #tpu.memory_space<vmem>>, vector<32x256xbf16>
    tpu.vector_store %arg11[%c0_7, %c128], %4 {strides = array<i32>} : memref<32x401xbf16, #tpu.memory_space<vmem>>, vector<32x256xbf16>,
    %c0_8 = arith.constant 0 : index
    %c0_9 = arith.constant 0 : index
    %c0_10 = arith.constant 0 : index
    %c16 = arith.constant 16 : index
    %6 = vector.load %arg3[%c0_8, %c0_9, %c0_10, %c16] : memref<1x1x32x32xbf16, #tpu.memory_space<vmem>>, vector<1x1x32x16xbf16>
    %7 = vector.shape_cast %6 : vector<1x1x32x16xbf16> to vector<32x16xbf16>
    %c0_11 = arith.constant 0 : index
    %c384 = arith.constant 384 : index
    %8 = vector.load %arg11[%c0_11, %c384] : memref<32x401xbf16, #tpu.memory_space<vmem>>, vector<32x16xbf16>
    tpu.vector_store %arg11[%c0_11, %c384], %7 {strides = array<i32>} : memref<32x401xbf16, #tpu.memory_space<vmem>>, vector<32x16xbf16>,
    %c0_12 = arith.constant 0 : index
    %c0_13 = arith.constant 0 : index
    %9 = vector.load %arg11[%c0_12, %c0_13] : memref<32x401xbf16, #tpu.memory_space<vmem>>, vector<32x401xbf16>
    %10 = tpu.iota {dimensions = array<i32: 1>} : vector<1x401xi32>
    %c16_i32 = arith.constant 16 : i32
    %c0_i32 = arith.constant 0 : i32
    %11 = arith.cmpi eq, %c16_i32, %c0_i32 : i32
    %c1_i32 = arith.constant 1 : i32
    %12 = arith.select %11, %c1_i32, %c16_i32 : i32
    %13 = vector.broadcast %12 : i32 to vector<1x401xi32>
    %14 = arith.remsi %10, %13 : vector<1x401xi32>
    %c0_i32_14 = arith.constant 0 : i32
    %15 = vector.broadcast %c0_i32_14 : i32 to vector<1x401xi32>
    %16 = arith.cmpi ne, %14, %15 : vector<1x401xi32>
    %c0_i32_15 = arith.constant 0 : i32
    %17 = vector.broadcast %c0_i32_15 : i32 to vector<1x401xi32>
    %18 = arith.cmpi slt, %14, %17 : vector<1x401xi32>
    %c0_i32_16 = arith.constant 0 : i32
    %19 = arith.cmpi slt, %12, %c0_i32_16 : i32
    %20 = vector.broadcast %19 : i1 to vector<1x401xi1>
    %21 = vector.broadcast %20 : vector<1x401xi1> to vector<1x401xi1>
    %22 = arith.xori %18, %21 : vector<1x401xi1>
    %23 = arith.andi %22, %16 : vector<1x401xi1>
    %24 = vector.broadcast %12 : i32 to vector<1x401xi32>
    %25 = arith.addi %14, %24 : vector<1x401xi32>
    %26 = arith.select %23, %25, %14 : vector<1x401xi1>, vector<1x401xi32>
    %c15_i32 = arith.constant 15 : i32
    %27 = vector.broadcast %c15_i32 : i32 to vector<1x401xi32>
    %28 = arith.cmpi ne, %26, %27 : vector<1x401xi32>
    %cst = arith.constant 0.000000e+00 : bf16
    %29 = vector.broadcast %cst : bf16 to vector<32x401xbf16>
    %30 = vector.shape_cast %28 : vector<1x401xi1> to vector<1x401xi1>
    %31 = vector.broadcast %30 : vector<1x401xi1> to vector<32x401xi1>
    %32 = arith.select %31, %9, %29 : vector<32x401xi1>, vector<32x401xbf16>
    %c0_i32_17 = arith.constant 0 : i32
    %33 = vector.broadcast %c0_i32_17 : i32 to vector<1x401xi32>
    %34 = arith.cmpi ne, %26, %33 : vector<1x401xi32>
    %cst_18 = arith.constant 0.000000e+00 : bf16
    %35 = vector.broadcast %cst_18 : bf16 to vector<32x401xbf16>
    %36 = vector.shape_cast %34 : vector<1x401xi1> to vector<1x401xi1>
    %37 = vector.broadcast %36 : vector<1x401xi1> to vector<32x401xi1>
    %38 = arith.select %37, %9, %35 : vector<32x401xi1>, vector<32x401xbf16>
    %39 = vector.extract_strided_slice %32 {offsets = [0, 111], sizes = [32, 256], strides = [1, 1]} : vector<32x401xbf16> to vector<32x256xbf16>
    %c0_19 = arith.constant 0 : index
    %c0_20 = arith.constant 0 : index
    %40 = vector.load %arg4[%c0_19, %c0_20] : memref<32x288xbf16, #tpu.memory_space<vmem>>, vector<32x32xbf16>
    %cst_21 = arith.constant dense<0.000000e+00> : vector<32x256xf32>
    %41 = tpu.matmul %40, %39, %cst_21 {dimension_numbers = #tpu.dot_dimension_numbers<[1], [0], [0], [1], [0, 0, 1, 1], [], []>} : vector<32x32xbf16>, vector<32x256xbf16>, vector<32x256xf32> -> vector<32x256xf32>
    %42 = vector.extract_strided_slice %9 {offsets = [0, 112], sizes = [32, 256], strides = [1, 1]} : vector<32x401xbf16> to vector<32x256xbf16>
    %c0_22 = arith.constant 0 : index
    %c32 = arith.constant 32 : index
    %43 = vector.load %arg4[%c0_22, %c32] : memref<32x288xbf16, #tpu.memory_space<vmem>>, vector<32x32xbf16>
    %cst_23 = arith.constant dense<0.000000e+00> : vector<32x256xf32>
    %44 = tpu.matmul %43, %42, %cst_23 {dimension_numbers = #tpu.dot_dimension_numbers<[1], [0], [0], [1], [0, 0, 1, 1], [], []>} : vector<32x32xbf16>, vector<32x256xbf16>, vector<32x256xf32> -> vector<32x256xf32>
    %45 = arith.addf %41, %44 : vector<32x256xf32>
    %46 = vector.extract_strided_slice %38 {offsets = [0, 113], sizes = [32, 256], strides = [1, 1]} : vector<32x401xbf16> to vector<32x256xbf16>
    %c0_24 = arith.constant 0 : index
    %c64 = arith.constant 64 : index
    %47 = vector.load %arg4[%c0_24, %c64] : memref<32x288xbf16, #tpu.memory_space<vmem>>, vector<32x32xbf16>
    %cst_25 = arith.constant dense<0.000000e+00> : vector<32x256xf32>
    %48 = tpu.matmul %47, %46, %cst_25 {dimension_numbers = #tpu.dot_dimension_numbers<[1], [0], [0], [1], [0, 0, 1, 1], [], []>} : vector<32x32xbf16>, vector<32x256xbf16>, vector<32x256xf32> -> vector<32x256xf32>
    %49 = arith.addf %45, %48 : vector<32x256xf32>
    %50 = vector.extract_strided_slice %32 {offsets = [0, 127], sizes = [32, 256], strides = [1, 1]} : vector<32x401xbf16> to vector<32x256xbf16>
    %c0_26 = arith.constant 0 : index
    %c96 = arith.constant 96 : index
    %51 = vector.load %arg4[%c0_26, %c96] : memref<32x288xbf16, #tpu.memory_space<vmem>>, vector<32x32xbf16>
    %cst_27 = arith.constant dense<0.000000e+00> : vector<32x256xf32>
    %52 = tpu.matmul %51, %50, %cst_27 {dimension_numbers = #tpu.dot_dimension_numbers<[1], [0], [0], [1], [0, 0, 1, 1], [], []>} : vector<32x32xbf16>, vector<32x256xbf16>, vector<32x256xf32> -> vector<32x256xf32>
    %53 = arith.addf %49, %52 : vector<32x256xf32>
    %54 = vector.extract_strided_slice %9 {offsets = [0, 128], sizes = [32, 256], strides = [1, 1]} : vector<32x401xbf16> to vector<32x256xbf16>
    %c0_28 = arith.constant 0 : index
    %c128_29 = arith.constant 128 : index
    %55 = vector.load %arg4[%c0_28, %c128_29] : memref<32x288xbf16, #tpu.memory_space<vmem>>, vector<32x32xbf16>
    %cst_30 = arith.constant dense<0.000000e+00> : vector<32x256xf32>
    %56 = tpu.matmul %55, %54, %cst_30 {dimension_numbers = #tpu.dot_dimension_numbers<[1], [0], [0], [1], [0, 0, 1, 1], [], []>} : vector<32x32xbf16>, vector<32x256xbf16>, vector<32x256xf32> -> vector<32x256xf32>
    %57 = arith.addf %53, %56 : vector<32x256xf32>
    %58 = vector.extract_strided_slice %38 {offsets = [0, 129], sizes = [32, 256], strides = [1, 1]} : vector<32x401xbf16> to vector<32x256xbf16>
    %c0_31 = arith.constant 0 : index
    %c160 = arith.constant 160 : index
    %59 = vector.load %arg4[%c0_31, %c160] : memref<32x288xbf16, #tpu.memory_space<vmem>>, vector<32x32xbf16>
    %cst_32 = arith.constant dense<0.000000e+00> : vector<32x256xf32>
    %60 = tpu.matmul %59, %58, %cst_32 {dimension_numbers = #tpu.dot_dimension_numbers<[1], [0], [0], [1], [0, 0, 1, 1], [], []>} : vector<32x32xbf16>, vector<32x256xbf16>, vector<32x256xf32> -> vector<32x256xf32>
    %61 = arith.addf %57, %60 : vector<32x256xf32>
    %62 = vector.extract_strided_slice %32 {offsets = [0, 143], sizes = [32, 256], strides = [1, 1]} : vector<32x401xbf16> to vector<32x256xbf16>
    %c0_33 = arith.constant 0 : index
    %c192 = arith.constant 192 : index
    %63 = vector.load %arg4[%c0_33, %c192] : memref<32x288xbf16, #tpu.memory_space<vmem>>, vector<32x32xbf16>
    %cst_34 = arith.constant dense<0.000000e+00> : vector<32x256xf32>
    %64 = tpu.matmul %63, %62, %cst_34 {dimension_numbers = #tpu.dot_dimension_numbers<[1], [0], [0], [1], [0, 0, 1, 1], [], []>} : vector<32x32xbf16>, vector<32x256xbf16>, vector<32x256xf32> -> vector<32x256xf32>
    %65 = arith.addf %61, %64 : vector<32x256xf32>
    %66 = vector.extract_strided_slice %9 {offsets = [0, 144], sizes = [32, 256], strides = [1, 1]} : vector<32x401xbf16> to vector<32x256xbf16>
    %c0_35 = arith.constant 0 : index
    %c224 = arith.constant 224 : index
    %67 = vector.load %arg4[%c0_35, %c224] : memref<32x288xbf16, #tpu.memory_space<vmem>>, vector<32x32xbf16>
    %cst_36 = arith.constant dense<0.000000e+00> : vector<32x256xf32>
    %68 = tpu.matmul %67, %66, %cst_36 {dimension_numbers = #tpu.dot_dimension_numbers<[1], [0], [0], [1], [0, 0, 1, 1], [], []>} : vector<32x32xbf16>, vector<32x256xbf16>, vector<32x256xf32> -> vector<32x256xf32>
    %69 = arith.addf %65, %68 : vector<32x256xf32>
    %70 = vector.extract_strided_slice %38 {offsets = [0, 145], sizes = [32, 256], strides = [1, 1]} : vector<32x401xbf16> to vector<32x256xbf16>
    %c0_37 = arith.constant 0 : index
    %c256 = arith.constant 256 : index
    %71 = vector.load %arg4[%c0_37, %c256] : memref<32x288xbf16, #tpu.memory_space<vmem>>, vector<32x32xbf16>
    %cst_38 = arith.constant dense<0.000000e+00> : vector<32x256xf32>
    %72 = tpu.matmul %71, %70, %cst_38 {dimension_numbers = #tpu.dot_dimension_numbers<[1], [0], [0], [1], [0, 0, 1, 1], [], []>} : vector<32x32xbf16>, vector<32x256xbf16>, vector<32x256xf32> -> vector<32x256xf32>
    %73 = arith.addf %69, %72 : vector<32x256xf32>
    %c0_39 = arith.constant 0 : index
    %c0_40 = arith.constant 0 : index
    %74 = vector.load %arg5[%c0_39, %c0_40] : memref<32x1xf32, #tpu.memory_space<vmem>>, vector<32x1xf32>
    %75 = vector.broadcast %74 : vector<32x1xf32> to vector<32x256xf32>
    %76 = arith.addf %73, %75 : vector<32x256xf32>
    %cst_41 = arith.constant 0.000000e+00 : f32
    %77 = vector.broadcast %cst_41 : f32 to vector<32x256xf32>
    %78 = arith.maximumf %76, %77 : vector<32x256xf32>
    %79 = arith.truncf %78 : vector<32x256xf32> to vector<32x256xbf16>
    %c0_42 = arith.constant 0 : index
    %c0_43 = arith.constant 0 : index
    %80 = vector.load %arg6[%c0_42, %c0_43] : memref<32x32xbf16, #tpu.memory_space<vmem>>, vector<32x32xbf16>
    %cst_44 = arith.constant dense<0.000000e+00> : vector<32x256xf32>
    %81 = tpu.matmul %80, %79, %cst_44 {dimension_numbers = #tpu.dot_dimension_numbers<[1], [0], [0], [1], [0, 0, 1, 1], [], []>} : vector<32x32xbf16>, vector<32x256xbf16>, vector<32x256xf32> -> vector<32x256xf32>
    %c0_45 = arith.constant 0 : index
    %c0_46 = arith.constant 0 : index
    %82 = vector.load %arg7[%c0_45, %c0_46] : memref<32x1xf32, #tpu.memory_space<vmem>>, vector<32x1xf32>
    %83 = vector.broadcast %82 : vector<32x1xf32> to vector<32x256xf32>
    %84 = arith.addf %81, %83 : vector<32x256xf32>
    %cst_47 = arith.constant 0.000000e+00 : f32
    %85 = vector.broadcast %cst_47 : f32 to vector<32x256xf32>
    %86 = arith.maximumf %84, %85 : vector<32x256xf32>
    %87 = arith.truncf %86 : vector<32x256xf32> to vector<32x256xbf16>
    %c0_48 = arith.constant 0 : index
    %c0_49 = arith.constant 0 : index
    %88 = vector.load %arg8[%c0_48, %c0_49] : memref<3x32xbf16, #tpu.memory_space<vmem>>, vector<3x32xbf16>
    %cst_50 = arith.constant dense<0.000000e+00> : vector<3x256xf32>
    %89 = tpu.matmul %88, %87, %cst_50 {dimension_numbers = #tpu.dot_dimension_numbers<[1], [0], [0], [1], [0, 0, 1, 1], [], []>} : vector<3x32xbf16>, vector<32x256xbf16>, vector<3x256xf32> -> vector<3x256xf32>
    %c0_51 = arith.constant 0 : index
    %c0_52 = arith.constant 0 : index
    %90 = vector.load %arg9[%c0_51, %c0_52] : memref<3x1xf32, #tpu.memory_space<vmem>>, vector<3x1xf32>
    %91 = vector.broadcast %90 : vector<3x1xf32> to vector<3x256xf32>
    %92 = arith.addf %89, %91 : vector<3x256xf32>
    %93 = arith.negf %92 : vector<3x256xf32>
    %94 = math.exp %93 : vector<3x256xf32>
    %cst_53 = arith.constant 1.000000e+00 : f32
    %95 = vector.broadcast %cst_53 : f32 to vector<3x256xf32>
    %96 = arith.addf %95, %94 : vector<3x256xf32>
    %97 = arith.divf %95, %96 : vector<3x256xf32>
    %c0_54 = arith.constant 0 : index
    %c0_55 = arith.constant 0 : index
    %c0_56 = arith.constant 0 : index
    %98 = vector.load %arg10[%c0_54, %c0_55, %c0_56] : memref<1x3x256xf32, #tpu.memory_space<vmem>>, vector<1x3x256xf32>
    %99 = vector.shape_cast %98 : vector<1x3x256xf32> to vector<3x256xf32>
    %100 = vector.shape_cast %97 : vector<3x256xf32> to vector<1x3x256xf32>
    tpu.vector_store %arg10[%c0_54, %c0_55, %c0_56], %100 {strides = array<i32>} : memref<1x3x256xf32, #tpu.memory_space<vmem>>, vector<1x3x256xf32>,
    return
  }
  func.func @transform_0(%arg0: i32, %arg1: i32) -> (i32, i32, i32) {
    %c0_i32 = arith.constant 0 : i32
    %c0_i32_0 = arith.constant 0 : i32
    return %arg0, %c0_i32, %arg1 : i32, i32, i32
  }
  func.func @transform_1(%arg0: i32, %arg1: i32) -> (i32, i32, i32, i32) {
    %c0_i32 = arith.constant 0 : i32
    %c0_i32_0 = arith.constant 0 : i32
    %c0_i32_1 = arith.constant 0 : i32
    return %arg0, %arg1, %c0_i32, %c0_i32_0 : i32, i32, i32, i32
  }
  func.func @transform_2(%arg0: i32, %arg1: i32) -> (i32, i32) {
    %c0_i32 = arith.constant 0 : i32
    %c0_i32_0 = arith.constant 0 : i32
    %c0_i32_1 = arith.constant 0 : i32
    return %c0_i32, %c0_i32_0 : i32, i32
  }
  func.func @transform_3(%arg0: i32, %arg1: i32) -> (i32, i32) {
    %c0_i32 = arith.constant 0 : i32
    %c0_i32_0 = arith.constant 0 : i32
    %c0_i32_1 = arith.constant 0 : i32
    return %c0_i32, %c0_i32_0 : i32, i32
  }
  func.func @transform_4(%arg0: i32, %arg1: i32) -> (i32, i32) {
    %c0_i32 = arith.constant 0 : i32
    %c0_i32_0 = arith.constant 0 : i32
    %c0_i32_1 = arith.constant 0 : i32
    return %c0_i32, %c0_i32_0 : i32, i32
  }
  func.func @transform_5(%arg0: i32, %arg1: i32) -> (i32, i32) {
    %c0_i32 = arith.constant 0 : i32
    %c0_i32_0 = arith.constant 0 : i32
    %c0_i32_1 = arith.constant 0 : i32
    return %c0_i32, %c0_i32_0 : i32, i32
  }
  func.func @transform_6(%arg0: i32, %arg1: i32) -> (i32, i32) {
    %c0_i32 = arith.constant 0 : i32
    %c0_i32_0 = arith.constant 0 : i32
    %c0_i32_1 = arith.constant 0 : i32
    return %c0_i32, %c0_i32_0 : i32, i32
  }
  func.func @transform_7(%arg0: i32, %arg1: i32) -> (i32, i32) {
    %c0_i32 = arith.constant 0 : i32
    %c0_i32_0 = arith.constant 0 : i32
    %c0_i32_1 = arith.constant 0 : i32
    return %c0_i32, %c0_i32_0 : i32, i32
  }
  func.func @transform_8(%arg0: i32, %arg1: i32) -> (i32, i32, i32) {
    %c0_i32 = arith.constant 0 : i32
    %c0_i32_0 = arith.constant 0 : i32
    return %arg0, %c0_i32, %arg1 : i32, i32, i32
  }
}

</mosaic_0001>

<bundles_post_ra>
// kernel: bev_head_forward.1
= control target key start
LH: loop header
LB: loop body
LE: loop exit
PB: predicated region body
PF: predicated region fallthrough
CT: control target
= control target key end

     0   :  { %s3449_s0 = inlined_call_operand.hbm [shape: bf16[2,32,256], index: 0, kind: input, shape index: {}]   ;;  %s3450_s1 = inlined_call_operand.hbm [shape: bf16[2,1,32,32], index: 1, kind: input, shape index: {}]   ;;  %s3451_s2 = inlined_call_operand.hbm [shape: bf16[32,288], index: 2, kind: input, shape index: {}]   ;;  %s3452_s3 = inlined_call_operand.hbm [shape: f32[32,1], index: 3, kind: input, shape index: {}]   ;;  %s3453_s4 = inlined_call_operand.hbm [shape: bf16[32,32], index: 4, kind: input, shape index: {}]   ;;  %s3454_s5 = inlined_call_operand.hbm [shape: f32[32,1], index: 5, kind: input, shape index: {}]   ;;  %s3455_s6 = inlined_call_operand.hbm [shape: bf16[3,32], index: 6, kind: input, shape index: {}]   ;;  %s3456_s7 = inlined_call_operand.hbm [shape: f32[3,1], index: 7, kind: input, shape index: {}]   ;;  %s3457_s8 = inlined_call_operand.hbm [shape: f32[2,3,256], index: 8, kind: output, shape index: {}]  }
   0x1   :  { %3466 = sst [smem:[#allocation25_spill]] %s3449_s0 }
   0x2   :  { %3467 = sst [smem:[#allocation26_spill]] %s3451_s2 }
   0x3   :  { %3468 = sst [smem:[#allocation27_spill]] %s3452_s3 }
   0x4   :  { %3469 = sst [smem:[#allocation28_spill]] %s3453_s4 }
   0x5   :  { %3470 = sst [smem:[#allocation29_spill]] %s3454_s5 }
   0x6   :  { %3471 = sst [smem:[#allocation30_spill]] %s3455_s6 }
   0x7   :  { %3472 = sst [smem:[#allocation31_spill]] %s3456_s7 }
   0x8   :  { %3473 = sst [smem:[#allocation32_spill]] %s3457_s8 }
   0x9   :  { %13 = vsyncpa [#allocation4], 0 }
   0xa   :  { %15 = vsyncpa [#allocation4 + $0x1], 0 }
   0xb   :  { %16 = vsyncpa [#allocation7], 0 }
   0xc   :  { %18 = vsyncpa [#allocation7 + $0x1], 0 }
   0xd   :  { %19 = vsyncpa [#allocation10], 0 }
   0xe   :  { %20 = vsyncpa [#allocation13], 0 }
   0xf   :  { %21 = vsyncpa [#allocation16], 0 }
  0x10   :  { %22 = vsyncpa [#allocation5], 0 }
  0x11   :  { %24 = vsyncpa [#allocation5 + $0x1], 0  ;;  %s2663_s27 = smov 0   ;;  %s2665_s28 = smov 0  }
  0x12   :  { %s2667_s29 = smov 0   ;;  %s2669_s30 = smov 0  }
  0x13   :  { %s2671_s9 = smov 0   ;;  %s2673_s10 = smov 0  }
  0x14 LB: > { %s2694_s11 = sadd.s32 4294967295, %s2589_s10   ;;  %p1950_p0 = scmp.ge.s32.totalorder %s2589_s10, 1  ;;  %s2589_s10 = sphi %s2673_s10, %s30_s10   ;;  %s2585_s9 = sphi %s2671_s9, %s3526_s9   ;;  %s2581_s30 = sphi %s2669_s30, %s3525_s30   ;;  %s2577_s29 = sphi %s2667_s29, %s3524_s29   ;;  %s2573_s28 = sphi %s2665_s28, %s3523_s28   ;;  %s2569_s27 = sphi %s2663_s27, %s3522_s27  }
  0x15   : > { %p3459_p1 = scmp.eq.s32.totalorder %s2694_s11, 0  ;;  %p257_p2 = scmp.lt.s32.totalorder %s2589_s10, 3 }
  0x16   : > { %s2591_s13 = smov [#allocation8]   ;;  %s2592_s16 = smov [#allocation9]  }
  0x17   : > { %p2699_p3 = pnand %p1950_p0, %p257_p2  ;;  %s269_s14 = sshll.u32 %s2591_s13, 4  ;;  %s2703_s14 = int_to_ptr.vmem [resolvable:$true] %s269_s14 }
  0x18   : > { %s282_s17 = sshll.u32 %s2592_s16, 4  ;;  %s3476_s2 = sld [smem:[#allocation26_spill]]  ;;  %s2714_s17 = int_to_ptr.vmem [resolvable:$true] %s282_s17 }
  0x19   : > { %s3474_s12 = scalar_select %p2699_p3, 1, 0 }
  0x1a   : > { %p2115_p4 = pneg %p2699_p3 }
  0x1c   : > { %p2710_p6 = pnand %p2115_p4, %p3459_p1 }
  0x1e   : > { %s2259_s20 = scalar_lea.hbm %s3476_s2, 768  ;;  %p2724_p8 = pneg %p2710_p6 }
  0x1f   : > { %p2260_p7 = scmp.ne.s32.totalorder %s3476_s2, %s2259_s20  ;;  %p2266_p11 = scmp.lt.u32.totalorder %s2259_s20, %s3476_s2 }
  0x21   : > { %p2262_p9 = pnand %p2724_p8, %p2260_p7 }
  0x23   : > { %p2263_p10 = pneg %p2262_p9 }
  0x25   : > { %p2268_p12 = pnand %p2266_p11, %p2263_p10 }
  0x27   : > { %2271 = shalt.err (!%p2268_p12)
}
  0x28   : > { %s2272_s26 = scalar_lea.vmem %s2703_s14, 768  ;;  %p2280_p4 = scmp.lt.s32.totalorder %s2703_s14, %s2703_s14 }
  0x29   : > { %p2273_p13 = scmp.ne.s32.totalorder %s2703_s14, %s2272_s26  ;;  %p2281_p5 = scmp.lt.s32.totalorder %s2272_s26, %s2272_s26 }
  0x2b   : > { %p2275_p0 = pnand %p2273_p13, %p2724_p8  ;;  %p2282_p7 = por %p2281_p5, %p2280_p4 }
  0x2d   : > { %p2276_p2 = pneg %p2275_p0 }
  0x2f   : > { %p2283_p9 = pnand %p2282_p7, %p2276_p2 }
  0x31   : > { %2286 = shalt.err (!%p2283_p9)
}
  0x32   : > { %s2593_s13 = smov 192   ;;  %s2594_s16 = smov 12  }
  0x33   : > { %2118 = dma.hbm_to_vmem [thread:$0]  (!%p2710_p6), %s3476_s2, 768, %s2703_s14, [#allocation7], %s2593_s13, %s2593_s13, %s2594_s16  }
  0x34   : > { %s3478_s3 = sld [smem:[#allocation27_spill]] }
  0x3a   : > { %s2287_s22 = scalar_lea.hbm %s3478_s3, 512 }
  0x3b   : > { %p2288_p5 = scmp.ne.s32.totalorder %s3478_s3, %s2287_s22  ;;  %p2294_p12 = scmp.lt.u32.totalorder %s2287_s22, %s3478_s3 }
  0x3d   : > { %p2290_p10 = pnand %p2288_p5, %p2724_p8 }
  0x3f   : > { %p2291_p11 = pneg %p2290_p10 }
  0x41   : > { %p2296_p13 = pnand %p2294_p12, %p2291_p11 }
  0x43   : > { %2299 = shalt.err (!%p2296_p13)
}
  0x44   : > { %s2300_s14 = scalar_lea.vmem %s2714_s17, 512  ;;  %p2308_p7 = scmp.lt.s32.totalorder %s2714_s17, %s2714_s17 }
  0x45   : > { %p2301_p0 = scmp.ne.s32.totalorder %s2714_s17, %s2300_s14  ;;  %p2309_p9 = scmp.lt.s32.totalorder %s2300_s14, %s2300_s14 }
  0x47   : > { %p2303_p2 = pnand %p2301_p0, %p2724_p8  ;;  %p2310_p5 = por %p2309_p9, %p2308_p7 }
  0x49   : > { %p2304_p4 = pneg %p2303_p2 }
  0x4b   : > { %p2311_p10 = pnand %p2310_p5, %p2304_p4 }
  0x4d   : > { %2314 = shalt.err (!%p2311_p10)
}
  0x4e   : > { %s3461_s13 = smov 128   ;;  %s3462_s8 = smov 8  }
  0x4f   : > { %2121 = dma.hbm_to_vmem [thread:$0]  (!%p2710_p6), %s3478_s3, 512, %s2714_s17, [#allocation10], %s3461_s13, %s3461_s13, %s3462_s8  }
  0x50   : > { %s2597_s19 = smov [#allocation12]   ;;  %s2598_s21 = smov [#allocation11]  }
  0x51   : > { %s308_s20 = sshll.u32 %s2597_s19, 4  ;;  %s295_s22 = sshll.u32 %s2598_s21, 4  ;;  %s309_s20 = int_to_ptr.vmem [resolvable:$true] %s308_s20  ;;  %s2771_s22 = int_to_ptr.vmem [resolvable:$true] %s295_s22 }
  0x52   : > { %s3479_s5 = sld [smem:[#allocation29_spill]] }
  0x58   : > { %s2315_s26 = scalar_lea.hbm %s3479_s5, 512 }
  0x59   : > { %p2316_p11 = scmp.ne.s32.totalorder %s3479_s5, %s2315_s26  ;;  %p2322_p0 = scmp.lt.u32.totalorder %s2315_s26, %s3479_s5 }
  0x5b   : > { %p2318_p12 = pnand %p2316_p11, %p2724_p8 }
  0x5d   : > { %p2319_p13 = pneg %p2318_p12 }
  0x5f   : > { %p2324_p2 = pnand %p2322_p0, %p2319_p13 }
  0x61   : > { %2327 = shalt.err (!%p2324_p2)
}
  0x62   : > { %s2328_s18 = scalar_lea.vmem %s309_s20, 512  ;;  %p2336_p5 = scmp.lt.s32.totalorder %s309_s20, %s309_s20 }
  0x63   : > { %p2329_p4 = scmp.ne.s32.totalorder %s309_s20, %s2328_s18  ;;  %p2337_p10 = scmp.lt.s32.totalorder %s2328_s18, %s2328_s18 }
  0x65   : > { %p2331_p7 = pnand %p2329_p4, %p2724_p8  ;;  %p2338_p1 = por %p2337_p10, %p2336_p5 }
  0x67   : > { %p2332_p9 = pneg %p2331_p7 }
  0x69   : > { %p2339_p3 = pnand %p2338_p1, %p2332_p9 }
  0x6b   : > { %2342 = shalt.err (!%p2339_p3)
}
  0x6c   : > { %2127 = dma.hbm_to_vmem [thread:$0]  (!%p2710_p6), %s3479_s5, 512, %s309_s20, [#allocation13], %s3461_s13, %s3461_s13, %s3462_s8  }
  0x6d   : > { %s3480_s4 = sld [smem:[#allocation28_spill]] }
  0x73   : > { %s2343_s25 = scalar_lea.hbm %s3480_s4, 256 }
  0x74   : > { %p2344_p11 = scmp.ne.s32.totalorder %s3480_s4, %s2343_s25  ;;  %p2350_p12 = scmp.lt.u32.totalorder %s2343_s25, %s3480_s4 }
  0x76   : > { %p2346_p1 = pnand %p2344_p11, %p2724_p8 }
  0x78   : > { %p2347_p3 = pneg %p2346_p1 }
  0x7a   : > { %p2352_p13 = pnand %p2350_p12, %p2347_p3 }
  0x7c   : > { %2355 = shalt.err (!%p2352_p13)
}
  0x7d   : > { %s2356_s20 = scalar_lea.vmem %s2771_s22, 256  ;;  %p2364_p7 = scmp.lt.s32.totalorder %s2771_s22, %s2771_s22 }
  0x7e   : > { %p2357_p0 = scmp.ne.s32.totalorder %s2771_s22, %s2356_s20  ;;  %p2365_p9 = scmp.lt.s32.totalorder %s2356_s20, %s2356_s20 }
  0x80   : > { %p2359_p2 = pnand %p2357_p0, %p2724_p8  ;;  %p2366_p5 = por %p2365_p9, %p2364_p7 }
  0x82   : > { %p2360_p4 = pneg %p2359_p2 }
  0x84   : > { %p2367_p10 = pnand %p2366_p5, %p2360_p4 }
  0x86   : > { %2370 = shalt.err (!%p2367_p10)
}
  0x87   : > { %s3463_s18 = smov 64   ;;  %s3464_s2 = smov 4  }
  0x88   : > { %2124 = dma.hbm_to_vmem [thread:$0]  (!%p2710_p6), %s3480_s4, 256, %s2771_s22, [#allocation10], %s3463_s18, %s3463_s18, %s3464_s2  }
  0x89   : > { %s2601_s24 = smov [#allocation14]   ;;  %s2602_s26 = smov [#allocation15]  }
  0x8a   : > { %s322_s25 = sshll.u32 %s2601_s24, 4  ;;  %s333_s14 = sshll.u32 %s2602_s26, 4  ;;  %s323_s25 = int_to_ptr.vmem [resolvable:$true] %s322_s25  ;;  %s2820_s14 = int_to_ptr.vmem [resolvable:$true] %s333_s14 }
  0x8b   : > { %s3481_s6 = sld [smem:[#allocation30_spill]] }
  0x91   : > { %s2371_s20 = scalar_lea.hbm %s3481_s6, 32 }
  0x92   : > { %p2372_p11 = scmp.ne.s32.totalorder %s3481_s6, %s2371_s20  ;;  %p2378_p12 = scmp.lt.u32.totalorder %s2371_s20, %s3481_s6 }
  0x94   : > { %p2374_p1 = pnand %p2372_p11, %p2724_p8 }
  0x96   : > { %p2375_p3 = pneg %p2374_p1 }
  0x98   : > { %p2380_p13 = pnand %p2378_p12, %p2375_p3 }
  0x9a   : > { %2383 = shalt.err (!%p2380_p13)
}
  0x9b   : > { %s2384_s21 = scalar_lea.vmem %s323_s25, 32  ;;  %p2392_p7 = scmp.lt.s32.totalorder %s323_s25, %s323_s25 }
  0x9c   : > { %p2385_p0 = scmp.ne.s32.totalorder %s323_s25, %s2384_s21  ;;  %p2393_p9 = scmp.lt.s32.totalorder %s2384_s21, %s2384_s21 }
  0x9e   : > { %p2387_p2 = pnand %p2385_p0, %p2724_p8  ;;  %p2394_p5 = por %p2393_p9, %p2392_p7 }
  0xa0   : > { %p2388_p4 = pneg %p2387_p2 }
  0xa2   : > { %p2395_p10 = pnand %p2394_p5, %p2388_p4 }
  0xa4   : > { %2398 = shalt.err (!%p2395_p10)
}
  0xa5   : > { %2130 = dma.hbm_to_vmem [thread:$0]  (!%p2710_p6), %s3481_s6, 32, %s323_s25, [#allocation13]  }
  0xa6   : > { %s3482_s7 = sld [smem:[#allocation31_spill]] }
  0xac   : > { %s2399_s16 = scalar_lea.hbm %s3482_s7, 64 }
  0xad   : > { %p2400_p11 = scmp.ne.s32.totalorder %s3482_s7, %s2399_s16  ;;  %p2406_p12 = scmp.lt.u32.totalorder %s2399_s16, %s3482_s7 }
  0xaf   : > { %p2402_p1 = pnand %p2400_p11, %p2724_p8 }
  0xb1   : > { %p2403_p3 = pneg %p2402_p1 }
  0xb3   : > { %p2408_p13 = pnand %p2406_p12, %p2403_p3 }
  0xb5   : > { %2411 = shalt.err (!%p2408_p13)
}
  0xb6   : > { %s2412_s25 = scalar_lea.vmem %s2820_s14, 64  ;;  %p2420_p7 = scmp.lt.s32.totalorder %s2820_s14, %s2820_s14 }
  0xb7   : > { %p2413_p0 = scmp.ne.s32.totalorder %s2820_s14, %s2412_s25  ;;  %p2421_p9 = scmp.lt.s32.totalorder %s2412_s25, %s2412_s25 }
  0xb9   : > { %p2415_p2 = pnand %p2413_p0, %p2724_p8  ;;  %p2422_p5 = por %p2421_p9, %p2420_p7 }
  0xbb   : > { %p2416_p4 = pneg %p2415_p2 }
  0xbd   : > { %p2423_p10 = pnand %p2422_p5, %p2416_p4 }
  0xbf   : > { %2426 = shalt.err (!%p2423_p10)
}
  0xc0   : > { %2133 = dma.hbm_to_vmem [thread:$0]  (!%p2710_p6), %s3482_s7, 64, %s2820_s14, [#allocation16]  }
  0xc1   : > { %s1949_s23 = sadd.s32 4294967294, %s2589_s10   ;;  %s42_s8 = sadd.s32 1, %s2585_s9 }
  0xc2   : > { %p44_p8 = scmp.ge.s32.totalorder %s42_s8, 2  ;;  %s51_s15 = sadd.s32 1, %s2577_s29 }
  0xc3   : > { %p58_p11 = scmp.ne.s32.totalorder %s2577_s29, %s2573_s28  ;;  %p59_p1 = scmp.eq.s32.totalorder %s2589_s10, 0 }
  0xc4   : > { %s3528_s8 = smov (%p44_p8, %s42_s8), 0  ;;  %p64_p12 = scmp.ne.s32.totalorder %s2573_s28, %s2569_s27 }
  0xc5   : > { %p2871_p3 = por %p59_p1, %p58_p11  ;;  %s46_s14 = ssub.s32 %s2585_s9, %s3528_s8 }
  0xc6   : > { %p244_p6 = scmp.eq.s32.totalorder %s2694_s11, 1  ;;  %p49_p13 = scmp.eq.s32.totalorder %s46_s14, 0 }
  0xc7   : > { %p3484_p0 = scmp.eq.s32.totalorder %s2694_s11, 0  ;;  %p250_p7 = scmp.eq.s32.totalorder %s1949_s23, 1 }
  0xc8   : > { %p2886_p4 = por %p244_p6, %p58_p11  ;;  %p2151_p5 = scmp.lt.s32.totalorder %s2589_s10, 2 }
  0xc9   : > { %p2882_p2 = por %p3484_p0, %p64_p12  ;;  %p2893_p9 = por %p250_p7, %p64_p12 }
  0xca   : > { %s3486_s16 = scalar_select %p2886_p4, 1, 0 }
  0xcb   : > { %s2891_s17 = scalar_select %p49_p13, %s2577_s29, %s51_s15  }
  0xcc   : > { %s3487_s20 = scalar_select %p2893_p9, 1, 0 }
  0xcd   : > { %s2899_s19 = sand.u32 1, %s2577_s29   ;;  %s2018_s22 = sshll.u32 %s2585_s9, 9 }
  0xce   : > { %s1958_s25 = sshll.u32 %s2899_s19, 5  ;;  %s3488_s0 = sld [smem:[#allocation25_spill]] }
  0xcf   : > { %s348_s23 = scalar_lea.vmem [#allocation3], %s1958_s25  ;;  %p2910_p10 = pnand %p2151_p5, %p2871_p3 }
  0xd0   : > { %s357_s15 = sshll.u32 %s348_s23, 4  ;;  %s345_s3 = scalar_lea.sflag [#allocation4], %s2899_s19  ;;  %s2914_s15 = int_to_ptr.vmem [resolvable:$true] %s357_s15 }
  0xd1   : > { %p2429_p11 = pneg %p2910_p10 }
  0xd4   : > { %s2906_s14 = scalar_lea.hbm %s3488_s0, %s2018_s22  ;;  %s2432_s25 = scalar_lea.hbm %s3488_s0, 1024 }
  0xd5   : > { %s2427_s21 = scalar_lea.hbm %s2906_s14, 512  ;;  %p2433_p3 = scmp.lt.u32.totalorder %s2906_s14, %s3488_s0 }
  0xd6   : > { %p2428_p8 = scmp.ne.s32.totalorder %s2906_s14, %s2427_s21  ;;  %p2434_p6 = scmp.lt.u32.totalorder %s2432_s25, %s2427_s21 }
  0xd7   : > { %p2436_p0 = scmp.lt.u32.totalorder %s2427_s21, %s2906_s14 }
  0xd8   : > { %p2430_p1 = pnand %p2429_p11, %p2428_p8  ;;  %p2435_p13 = por %p2434_p6, %p2433_p3 }
  0xda   : > { %p2431_p12 = pneg %p2430_p1  ;;  %p2437_p7 = por %p2436_p0, %p2435_p13 }
  0xdc   : > { %p2438_p5 = pnand %p2437_p7, %p2431_p12 }
  0xde   : > { %2441 = shalt.err (!%p2438_p5)
}
  0xdf   : > { %s2442_s2 = scalar_lea.vmem %s2914_s15, 512  ;;  %s2603_s22 = smov [#allocation3]  }
  0xe0   : > { %p2443_p8 = scmp.ne.s32.totalorder %s2914_s15, %s2442_s2  ;;  %s2447_s24 = sshll.u32 %s2603_s22, 4  ;;  %s2448_s24 = int_to_ptr.vmem [resolvable:$false] %s2447_s24 }
  0xe1   : > { %s2449_s13 = scalar_lea.vmem %s2448_s24, 1024  ;;  %p2450_p4 = scmp.lt.s32.totalorder %s2914_s15, %s2448_s24 }
  0xe2   : > { %p2445_p1 = pnand %p2443_p8, %p2429_p11  ;;  %p2451_p3 = scmp.lt.s32.totalorder %s2449_s13, %s2442_s2 }
  0xe4   : > { %p2446_p9 = pneg %p2445_p1  ;;  %p2452_p6 = por %p2451_p3, %p2450_p4 }
  0xe6   : > { %p2453_p13 = pnand %p2452_p6, %p2446_p9 }
  0xe8   : > { %2456 = shalt.err (!%p2453_p13)
}
  0xe9   : > { %s3490_s21 = smov 8   ;;  %s3491_s25 = smov 128  }
  0xea   : > { %2137 = dma.hbm_to_vmem [thread:$0]  (!%p2910_p10), %s2906_s14, 512, %s2914_s15, %s345_s3, %s3491_s25, %s3491_s25, %s3490_s21  }
  0xeb   : > { %s1961_s23 = sshll.u32 %s2899_s19, 4  ;;  %s2019_s22 = sshll.u32 %s2585_s9, 8 }
  0xec   : > { %s2953_s13 = scalar_lea.hbm %s3450_s1, %s2019_s22  ;;  %s371_s0 = scalar_lea.vmem [#allocation6], %s1961_s23 }
  0xed   : > { %s380_s4 = sshll.u32 %s371_s0, 4  ;;  %s3492_s5 = sand.u32 1, %s2589_s10   ;;  %s2955_s4 = int_to_ptr.vmem [resolvable:$true] %s380_s4 }
  0xee   : > { %s2959_s6 = scalar_lea.sflag [#allocation7], %s3492_s5  ;;  %s2457_s7 = scalar_lea.hbm %s2953_s13, 256 }
  0xef   : > { %p2458_p4 = scmp.ne.s32.totalorder %s2953_s13, %s2457_s7  ;;  %s2462_s14 = scalar_lea.hbm %s3450_s1, 512 }
  0xf0   : > { %p2463_p0 = scmp.lt.u32.totalorder %s2953_s13, %s3450_s1  ;;  %p2464_p7 = scmp.lt.u32.totalorder %s2462_s14, %s2457_s7 }
  0xf1   : > { %p2460_p9 = pnand %p2458_p4, %p2429_p11  ;;  %p2466_p8 = scmp.lt.u32.totalorder %s2457_s7, %s2953_s13 }
  0xf2   : > { %p2465_p5 = por %p2464_p7, %p2463_p0 }
  0xf3   : > { %p2461_p12 = pneg %p2460_p9 }
  0xf4   : > { %p2467_p1 = por %p2466_p8, %p2465_p5 }
  0xf6   : > { %p2468_p3 = pnand %p2467_p1, %p2461_p12 }
  0xf8   : > { %2471 = shalt.err (!%p2468_p3)
}
  0xf9   : > { %s2472_s0 = scalar_lea.vmem %s2955_s4, 256  ;;  %s2604_s5 = smov [#allocation6]  }
  0xfa   : > { %p2473_p6 = scmp.ne.s32.totalorder %s2955_s4, %s2472_s0  ;;  %s2477_s25 = sshll.u32 %s2604_s5, 4  ;;  %s2478_s25 = int_to_ptr.vmem [resolvable:$false] %s2477_s25 }
  0xfb   : > { %s2479_s23 = scalar_lea.vmem %s2478_s25, 512  ;;  %p2480_p9 = scmp.lt.s32.totalorder %s2955_s4, %s2478_s25 }
  0xfc   : > { %p2475_p13 = pnand %p2473_p6, %p2429_p11  ;;  %p2481_p0 = scmp.lt.s32.totalorder %s2479_s23, %s2472_s0 }
  0xfe   : > { %p2476_p4 = pneg %p2475_p13  ;;  %p2482_p7 = por %p2481_p0, %p2480_p9 }
 0x100   : > { %p2483_p5 = pnand %p2482_p7, %p2476_p4 }
 0x102   : > { %2486 = shalt.err (!%p2483_p5)
}
 0x103   : > { %s3493_s7 = smov 4   ;;  %s3494_s22 = smov 64  }
 0x104   : > { %2140 = dma.hbm_to_vmem [thread:$0]  (!%p2910_p10), %s2953_s13, 256, %s2955_s4, %s2959_s6, %s3494_s22, %s3494_s22, %s3493_s7  }
 0x105   : > { %p3495_p11 = scmp.ne.s32.totalorder %s3474_s12, 0 }
 0x106   : > { %s2991_s2 = sand.u32 (!%p3495_p11), 1, %s2573_s28  }
 0x107   : > { %392 = sbr.rel (%p3495_p11) target bundleno = 1317 (0x525), region = 52  ;;  %s1965_s24 = sshll.u32 (!%p3495_p11), %s2991_s2, 5 }
 0x108   : > { %s395_s3 = scalar_lea.sflag (!%p3495_p11), [#allocation4], %s2991_s2  ;;  %s2995_s19 = scalar_lea.vmem (!%p3495_p11), [#allocation3], %s1965_s24 }
 0x10e   : > { %2540 = dma.done.wait (%p2882_p2), %s395_s3, 512  }
 0x10f   : > { %2542 = vsyncadd (%p2882_p2), %s395_s3, 4294966784  ;;  %s403_s4 = sand.u32 1, %s2694_s11   ;;  %s1966_s6 = sshll.u32 %s2991_s2, 4 }
 0x110   : > { %s404_s12 = scalar_lea.sflag [#allocation7], %s403_s4  ;;  %s3003_s18 = scalar_lea.vmem [#allocation6], %s1966_s6 }
 0x111   : > { %2544 = dma.done.wait (%p2882_p2), %s404_s12, 256  }
 0x112   : > { %2546 = vsyncadd (%p2882_p2), %s404_s12, 4294967040  ;;  %p3496_p10 = scmp.eq.s32.totalorder %s2694_s11, 0 }
 0x114   : > { %2548 = dma.done.wait (%p3496_p10), [#allocation7], 768   ;;  %p3497_p12 = pmov %p3496_p10 }
 0x115   : > { %p3498_p8 = pmov %p3496_p10 }
 0x116   : > { %2550 = vsyncadd (%p3497_p12), [#allocation7], 4294966528 }
 0x117   : > { %2552 = dma.done.wait (%p3498_p8), [#allocation10], 768   ;;  %p3499_p1 = pmov %p3498_p8 }
 0x119   : > { %2554 = vsyncadd (%p3499_p1), [#allocation10], 4294966528  ;;  %p3500_p3 = pmov %p3499_p1 }
 0x11a   : > { %p3501_p6 = pmov %p3499_p1 }
 0x11b   : > { %2556 = dma.done.wait (%p3500_p3), [#allocation13], 544  }
 0x11c   : > { %2558 = vsyncadd (%p3501_p6), [#allocation13], 4294966752  ;;  %p3502_p2 = pmov %p3499_p1 }
 0x11d   : > { %p3503_p13 = pmov %p3499_p1 }
 0x11e   : > { %2560 = dma.done.wait (%p3502_p2), [#allocation16], 64  }
 0x11f   : > { %2562 = vsyncadd (%p3503_p13), [#allocation16], 4294967232  ;;  %v556_v0 = vlaneseq  ;;  %v2605_v1 = vmov 0   ;;  %v2233_v11 = vld [vmem:[%s3003_s18 + $0x8] sm:$0xff]   ;;  %v2234_v13 = vld [vmem:[%s3003_s18] sm:$0xff]   ;;  %s2606_s11 = smov 112  }
 0x120   : > { %1130 = vmatprep.mubr.bf16.mxu0 %v2605_v1  ;;  %781 = vmatprep.mubr.bf16.mxu1 %v2605_v1  ;;  %v2235_v15 = vld [vmem:[%s3003_s18] sm:$0xff]   ;;  %v2236_v17 = vld [vmem:[%s3003_s18 + $0x8] sm:$0xff]   ;;  %s2607_s26 = smov 16   ;;  %s2608_s13 = smov 127  }
 0x121   : > { %v557_v2 = vand.u32 127, %v556_v0  ;;  %v626_v3 = vshrl.u32 %v556_v0, 7  ;;  %2232 = vset.pattern.permute.xlu1 %v2605_v1  ;;  %2231 = vset.pattern.permute.xlu0 %v2605_v1  ;;  %v3044_v18 = vld [vmem:[%s2995_s19] ss:$8 sps:$4 sm:$0xff]   ;;  %v3051_v20 = vld [vmem:[%s2995_s19 + $0x10] ss:$8 sps:$4 sm:$0xff]  }
 0x122   : > { %541 = vrot.lane.b32.xlu1 %v2233_v11, %s2606_s11  ;;  %539 = vrot.lane.b32.xlu0 %v2234_v13, %s2606_s11  ;;  %v3063_v23 = vld [vmem:[%s2995_s19 + $0x4] ss:$8 sps:$4 sm:$0xff]   ;;  %v3068_v24 = vld [vmem:[%s2995_s19 + $0x14] ss:$8 sps:$4 sm:$0xff]   ;;  %s2609_s14 = smov 96   ;;  %s2610_s15 = smov 17  }
 0x123   : > { %v559_v4 = vadd.s32 256, %v557_v2  ;;  %v560_v5 = vadd.s32 384, %v557_v2  ;;  %v558_v6 = vadd.s32 128, %v557_v2  ;;  %v3029_v9 = vsub.s32 0, %v626_v3  ;;  %1098 = vmatprep.subr.bf16.mxu0 %v3063_v23  ;;  %v3145_v42 = vld [vmem:[#allocation8 + $0x4] ss:$12 sps:$4 sm:$0xff]  }
 0x124   : > { %v565_v10 = vand.u32 15, %v557_v2  ;;  %v3033_v14 = vsub.s32 4, %v626_v3  ;;  %1099 = vmatpush1.bf16.msra.mxu0 %v3044_v18  ;;  %v3151_v44 = vld [vmem:[#allocation8] ss:$12 sps:$4 sm:$0xff]   ;;  %s2611_s21 = smov 113   ;;  %s2612_s0 = smov 15  }
 0x125   : > { %v579_v7 = vand.u32 15, %v559_v4  ;;  %v586_v8 = vand.u32 15, %v560_v5  ;;  %v572_v12 = vand.u32 15, %v558_v6  ;;  %1100 = vmatprep.subr.bf16.mxu0 %v3068_v24  ;;  %v3175_v48 = vld [vmem:[#allocation8 + $0x18] ss:$12 sps:$4 sm:$0xff]   ;;  %s2613_s5 = smov 64  }
 0x126   : > { %vm3046_vm2 = vcmp.ne.s32.totalorder %v565_v10, 0  ;;  %vm3053_vm4 = vcmp.ne.s32.totalorder %v565_v10, 15  ;;  %490 = vrot.lane.b32.xlu1 %v2236_v17, %s2606_s11  ;;  %488 = vrot.lane.b32.xlu0 %v2235_v15, %s2606_s11  ;;  %v3183_v50 = vld [vmem:[#allocation8 + $0x1c] ss:$12 sps:$4 sm:$0xff]   ;;  %s2614_s25 = smov 32   ;;  %s2615_s23 = smov 1  }
 0x127   : > { %vm3037_vm0 = vcmp.ne.s32.totalorder %v579_v7, 0  ;;  %vm656_vm1 = vcmp.ne.s32.totalorder %v586_v8, 0  ;;  %vm654_vm3 = vcmp.ne.s32.totalorder %v572_v12, 0  ;;  %vm3057_vm5 = vcmp.ne.s32.totalorder %v572_v12, 15  ;;  %s2616_s7 = smov 111   ;;  %v1543_v16 = vld [vmem:[#allocation9] sm:$0xff] }
 0x128   : > { %vm666_vm6 = vmpackc.low %vm656_vm1, %vm3037_vm0  ;;  %vm3070_vm7 = vcmp.ne.s32.totalorder %v579_v7, 15  ;;  %vm3074_vm8 = vcmp.ne.s32.totalorder %v586_v8, 15  ;;  %1101 = vmatpush1.bf16.msra.mxu0 %v3051_v20  ;;  %vm742_vm0 = vcmask 261120   ;;  %vm545_vm1 = vcmask 130048   ;;  %v1546_v19 = vld [vmem:[#allocation9 + $0x18] sm:$0xff]  ;;  %v1545_v22 = vld [vmem:[#allocation9 + $0x10] sm:$0xff] }
 0x129   : > { %v3080_v27 = vsel %vm666_vm6, 65537, %v2605_v1  ;;  %vm665_vm9 = vmpackc.low %vm654_vm3, %vm3046_vm2  ;;  %vm494_vm2 = vcmask 1048448   ;;  %v1594_v26 = vld [vmem:[#allocation12 + $0x18] sm:$0xff]  ;;  %s1973_s22 = sshll.u32 %s2991_s2, 3  ;;  %s2020_s24 = sshll.u32 %s2581_s30, 7 }
 0x12a   : > { %v680_v28 = vrot.slane %v3080_v27, %v3029_v9  ;;  %v3087_v29 = vsel %vm665_vm9, 65537, %v2605_v1  ;;  %vm621_vm10 = vmpackc.low %vm3057_vm5, %vm3053_vm4  ;;  %v684_v30 = vrot.slane %v3080_v27, %v3033_v14  ;;  %725 = vrot.lane.b32.xlu1 %v3063_v23, %s2607_s26  ;;  %723 = vrot.lane.b32.xlu0 %v3044_v18, %s2607_s26  ;;  %vm1271_vm9 = vcmask 924672   ;;  %s468_s3 = scalar_lea.vmem [#allocation17], %s1973_s22  ;;  %s3518_s12 = sld [smem:[#allocation32_spill]] }
 0x12b   : > { %v676_v31 = vrot.slane %v3087_v29, %v3033_v14  ;;  %v3099_v32 = vsel %vm621_vm10, 65537, %v2605_v1  ;;  %vm622_vm11 = vmpackc.low %vm3074_vm8, %vm3070_vm7  ;;  %v672_v33 = vrot.slane %v3087_v29, %v3029_v9  ;;  %1994 = vmatmul.mubr.msk.bf16.vlgmr.msra.gmra.mrb[0].mxu0 %vm742_vm0, %v3145_v42  ;;  %vm1177_vm7 = vcmask 1039360   ;;  %s1781_s19 = sshll.u32 %s468_s3, 4  ;;  %p3519_p9 = scmp.ne.s32.totalorder %s3486_s16, 0  ;;  %s3402_s19 = int_to_ptr.vmem [resolvable:$true] %s1781_s19 }
 0x12c   : > { %v628_v34 = vrot.slane %v3099_v32, %v3029_v9  ;;  %vm687_vm12 = vcmp.ne.s16.totalorder %v680_v28, 0  ;;  %v3116_v35 = vsel %vm622_vm11, 65537, %v2605_v1  ;;  %v632_v41 = vrot.slane %v3099_v32, %v3033_v14  ;;  %1140 = vmatprep.mubr.bf16.mxu0 %v2605_v1  ;;  %v1593_v28 = vld [vmem:[#allocation12 + $0x10] sm:$0xff]  ;;  %s2617_s30 = smov [#allocation17]  }
 0x12d   : > { %vm686_vm13 = vcmp.ne.s16.totalorder %v676_v31, 0  ;;  %v640_v36 = vrot.slane %v3116_v35, %v3033_v14  ;;  %v3126_v37 = vsel %vm687_vm12, %v3063_v23, 0  ;;  %v3139_v40 = vsel %vm687_vm12, %v3068_v24, 0  ;;  %v1697_v31 = vld [vmem:[#allocation15] sm:$0x7] }
 0x12e   : > { %731 = vrot.lane.b32.xlu1 %v3068_v24, %s2607_s26  ;;  %729 = vrot.lane.b32.xlu0 %v3051_v20, %s2607_s26  ;;  %v3129_v38 = vsel %vm686_vm13, %v3044_v18, 0  ;;  %v3136_v39 = vsel %vm686_vm13, %v3051_v20, 0  ;;  %v636_v43 = vrot.slane %v3116_v35, %v3029_v9  ;;  %vm3153_vm14 = vcmp.ne.s16.totalorder %v632_v41, 0 }
 0x12f   : > { %v3162_v46 = vsel %vm3153_vm14, %v3044_v18, 0  ;;  %v3188_v51 = vsel %vm3153_vm14, %v3051_v20, 0  ;;  %vm688_vm3 = vcmp.ne.s16.totalorder %v684_v30, 0  ;;  %vm644_vm4 = vcmp.ne.s16.totalorder %v640_v36, 0 }
 0x130   : > { %vm643_vm15 = vcmp.ne.s16.totalorder %v636_v43, 0  ;;  %vm641_vm5 = vcmp.ne.s16.totalorder %v628_v34, 0  ;;  %vm685_vm6 = vcmp.ne.s16.totalorder %v672_v33, 0  ;;  %vm820_vm8 = vcmask 138240   ;;  %s3400_s18 = scalar_lea.hbm %s3518_s12, %s2020_s24 }
 0x131   : > { %v3165_v47 = vsel %vm643_vm15, %v3063_v23, 0  ;;  %v3178_v49 = vsel %vm643_vm15, %v3068_v24, 0  ;;  %vm910_vm10 = vcmask 121856   ;;  %vm1365_vm11 = vcmask 916480  }
 0x132   : > { %1165 = vrot.lane.b32.xlu1 %v3129_v38, %s2608_s13  ;;  %1167 = vrot.lane.b32.xlu0 %v3126_v37, %s2608_s13  ;;  %vm1002_vm12 = vcmask 7168   ;;  %vm1467_vm13 = vcmask 908288  }
 0x133   : > { %1995 = vmatmul.mubr.msk.bf16.gmra.mrb[4].mxu0 %vm742_vm0, %v3183_v50 }
 0x134   : > { %1224 = vmatprep.mubr.bf16.mxu0 %v2605_v1 }
 0x136   : > { %1171 = vrot.lane.b32.xlu1 %v3136_v39, %s2608_s13  ;;  %1173 = vrot.lane.b32.xlu0 %v3139_v40, %s2608_s13 }
 0x13a   : > { %1159 = vrot.lane.b32.xlu1 %v3145_v42, %s2609_s14  ;;  %711 = vrot.lane.b32.xlu0 %v3151_v44, %s2609_s14 }
 0x13e   : > { %812 = vrot.lane.b32.xlu1 %v3165_v47, %s2610_s15  ;;  %810 = vrot.lane.b32.xlu0 %v3162_v46, %s2610_s15 }
 0x142   : > { %1259 = vrot.lane.b32.xlu1 %v3162_v46, %s2611_s21  ;;  %1261 = vrot.lane.b32.xlu0 %v3165_v47, %s2611_s21 }
 0x146   : > { %818 = vrot.lane.b32.xlu1 %v3178_v49, %s2610_s15  ;;  %713 = vrot.lane.b32.xlu0 %v3175_v48, %s2609_s14 }
 0x14a   : > { %1265 = vrot.lane.b32.xlu1 %v3188_v51, %s2611_s21  ;;  %1161 = vrot.lane.b32.xlu0 %v3183_v50, %s2609_s14 }
 0x14e   : > { %900 = vrot.lane.b32.xlu1 %v3129_v38, %s2612_s0  ;;  %816 = vrot.lane.b32.xlu0 %v3188_v51, %s2610_s15 }
 0x152   : > { %1355 = vrot.lane.b32.xlu1 %v3063_v23, %s2606_s11  ;;  %1267 = vrot.lane.b32.xlu0 %v3178_v49, %s2611_s21  ;;  %v1592_v23 = vld [vmem:[#allocation12 + $0x8] sm:$0xff] }
 0x156   : > { %1353 = vrot.lane.b32.xlu1 %v3044_v18, %s2606_s11  ;;  %1253 = vrot.lane.b32.xlu0 %v3145_v42, %s2613_s5  ;;  %v1544_v18 = vld [vmem:[#allocation9 + $0x8] sm:$0xff] }
 0x15a   : > { %908 = vrot.lane.b32.xlu1 %v3139_v40, %s2612_s0  ;;  %902 = vrot.lane.b32.xlu0 %v3126_v37, %s2612_s0 }
 0x15e   : > { %1255 = vrot.lane.b32.xlu0 %v3183_v50, %s2613_s5 }
 0x162   : > { %906 = vrot.lane.b32.xlu0 %v3136_v39, %s2612_s0 }
 0x194   : > { %v542_v52 = vpop.permute.xlu1 %541  ;;  %v540_v53 = vpop.permute.xlu0 %539 }
 0x195   : > { %547 = vst.msk [vmem:[#allocation2 + $0x38] sm:$0xff] %vm545_vm1, %v542_v52  ;;  %546 = vst.msk [vmem:[#allocation2 + $0x18] sm:$0xff] %vm545_vm1, %v540_v53 }
 0x198   : > { %v491_v54 = vpop.permute.xlu1 %490  ;;  %v489_v55 = vpop.permute.xlu0 %488 }
 0x199   : > { %496 = vst.msk [vmem:[#allocation2 + $0x20] sm:$0xff] %vm494_vm2, %v491_v54  ;;  %495 = vst.msk [vmem:[#allocation2] sm:$0xff] %vm494_vm2, %v489_v55 }
 0x19c   : > { %v555_v56 = vld [vmem:[#allocation2 + $0x38] sm:$0xff]  ;;  %v3225_v58 = vpop.permute.xlu0 %723  ;;  %v726_v59 = vpop.permute.xlu1 %725 }
 0x19d   : > { %1363 = vrot.lane.b32.xlu1 %v555_v56, %s2606_s11  ;;  %v551_v57 = vld [vmem:[#allocation2 + $0x18] sm:$0xff]  ;;  %v735_v61 = vsel %vm545_vm1, %v3225_v58, %v726_v59  ;;  %v696_v0 = vsel %vm688_vm3, %v555_v56, 0  ;;  %v652_v4 = vsel %vm644_vm4, %v555_v56, 0 }
 0x19e   : > { %v692_v60 = vsel %vm688_vm3, %v551_v57, 0  ;;  %749 = vmatprep.subr.bf16.mxu1 %v735_v61  ;;  %v648_v2 = vsel %vm644_vm4, %v551_v57, 0 }
 0x1a0   : > { %v548_v62 = vld [vmem:[#allocation2] sm:$0xff]  ;;  %v3261_v7 = vpop.permute.xlu0 %729  ;;  %v3266_v9 = vpop.permute.xlu1 %731 }
 0x1a1   : > { %1169 = vrot.lane.b32.xlu1 %v692_v60, %s2608_s13  ;;  %721 = vrot.lane.b32.xlu0 %v548_v62, %s2607_s26  ;;  %v552_v63 = vld [vmem:[#allocation2 + $0x20] sm:$0xff]  ;;  %v645_v3 = vsel %vm641_vm5, %v548_v62, 0  ;;  %v689_v6 = vsel %vm685_vm6, %v548_v62, 0 }
 0x1a2   : > { %v649_v5 = vsel %vm641_vm5, %v552_v63, 0  ;;  %v693_v8 = vsel %vm685_vm6, %v552_v63, 0 }
 0x1a4   : > { %v1168_v10 = vpop.permute.xlu0 %1167  ;;  %v1166_v11 = vpop.permute.xlu1 %1165 }
 0x1a5   : > { %1175 = vrot.lane.b32.xlu1 %v696_v0, %s2608_s13  ;;  %727 = vrot.lane.b32.xlu0 %v552_v63, %s2607_s26  ;;  %s2487_s26 = scalar_lea.vmem %s3402_s19, 128  ;;  %s2491_s13 = sshll.u32 %s2617_s30, 4  ;;  %s2492_s13 = int_to_ptr.vmem [resolvable:$false] %s2491_s13 }
 0x1a6   : > { %p2488_p4 = scmp.ne.s32.totalorder %s3402_s19, %s2487_s26  ;;  %s2493_s14 = scalar_lea.vmem %s2492_s13, 256 }
 0x1a7   : > { %p2494_p5 = scmp.lt.s32.totalorder %s3402_s19, %s2492_s13  ;;  %p2495_p11 = scmp.lt.s32.totalorder %s2493_s14, %s2487_s26 }
 0x1a8   : > { %v3271_v12 = vpop.permute.xlu0 %1173  ;;  %v1172_v13 = vpop.permute.xlu1 %1171  ;;  %p2489_p0 = pnand %p2488_p4, %p3519_p9 }
 0x1a9   : > { %1359 = vrot.lane.b32.xlu1 %v3051_v20, %s2606_s11  ;;  %1361 = vrot.lane.b32.xlu0 %v3068_v24, %s2606_s11  ;;  %v1591_v24 = vld [vmem:[#allocation12] sm:$0xff]  ;;  %v1180_v55 = vsel %vm1177_vm7, %v1172_v13, %v3271_v12  ;;  %p2496_p10 = por %p2495_p11, %p2494_p5 }
 0x1aa   : > { %p2490_p7 = pneg %p2489_p0 }
 0x1ac   : > { %v3274_v14 = vpop.permute.xlu0 %711  ;;  %v3279_v15 = vpop.permute.xlu1 %1159  ;;  %p2497_p12 = pnand %p2496_p10, %p2490_p7 }
 0x1ad   : > { %1263 = vrot.lane.b32.xlu1 %v648_v2, %s2611_s21  ;;  %1357 = vrot.lane.b32.xlu0 %v551_v57, %s2606_s11  ;;  %s1765_s11 = scalar_lea.sflag [#allocation5], %s2991_s2 }
 0x1b0   : > { %v3281_v17 = vpop.permute.xlu0 %810  ;;  %v813_v20 = vpop.permute.xlu1 %812 }
 0x1b1   : > { %808 = vrot.lane.b32.xlu1 %v645_v3, %s2610_s15  ;;  %888 = vrot.lane.b32.xlu0 %v3151_v44, %s2613_s5  ;;  %v822_v57 = vsel %vm820_vm8, %v3281_v17, %v813_v20 }
 0x1b4   : > { %v3285_v21 = vpop.permute.xlu0 %1261  ;;  %v1260_v25 = vpop.permute.xlu1 %1259 }
 0x1b5   : > { %1269 = vrot.lane.b32.xlu1 %v652_v4, %s2611_s21  ;;  %814 = vrot.lane.b32.xlu0 %v649_v5, %s2610_s15  ;;  %v1272_v63 = vsel %vm1271_vm9, %v1260_v25, %v3285_v21 }
 0x1b8   : > { %v714_v27 = vpop.permute.xlu0 %713  ;;  %v819_v29 = vpop.permute.xlu1 %818 }
 0x1b9   : > { %1347 = vrot.lane.b32.xlu1 %v3145_v42, %s2614_s25  ;;  %992 = vrot.lane.b32.xlu0 %v3162_v46, %s2615_s23 }
 0x1bc   : > { %v1162_v30 = vpop.permute.xlu0 %1161  ;;  %v1266_v32 = vpop.permute.xlu1 %1265 }
 0x1bd   : > { %994 = vrot.lane.b32.xlu1 %v3165_v47, %s2615_s23  ;;  %1457 = vrot.lane.b32.xlu0 %v3126_v37, %s2616_s7 }
 0x1c0   : > { %v3287_v33 = vpop.permute.xlu0 %816  ;;  %v3289_v34 = vpop.permute.xlu1 %900 }
 0x1c1   : > { %898 = vrot.lane.b32.xlu1 %v689_v6, %s2612_s0  ;;  %890 = vrot.lane.b32.xlu0 %v3175_v48, %s2613_s5  ;;  %v824_v4 = vsel %vm820_vm8, %v3287_v33, %v819_v29 }
 0x1c4   : > { %v1268_v35 = vpop.permute.xlu0 %1267  ;;  %v3291_v36 = vpop.permute.xlu1 %1355 }
 0x1c5   : > { %1455 = vrot.lane.b32.xlu1 %v3129_v38, %s2616_s7  ;;  %904 = vrot.lane.b32.xlu0 %v693_v8, %s2612_s0  ;;  %v1274_v8 = vsel %vm1271_vm9, %v1266_v32, %v1268_v35 }
 0x1c8   : > { %v3293_v37 = vpop.permute.xlu0 %1253  ;;  %v3295_v38 = vpop.permute.xlu1 %1353 }
 0x1c9   : > { %1000 = vrot.lane.b32.xlu1 %v3178_v49, %s2615_s23  ;;  %1349 = vrot.lane.b32.xlu0 %v3183_v50, %s2614_s25  ;;  %v1178_v49 = vsel %vm1177_vm7, %v1166_v11, %v1168_v10 }
 0x1cd   : > { %1459 = vrot.lane.b32.xlu1 %v692_v60, %s2616_s7  ;;  %998 = vrot.lane.b32.xlu0 %v3188_v51, %s2615_s23  ;;  %v737_v51 = vsel %vm545_vm1, %v3261_v7, %v3266_v9 }
 0x1d1   : > { %990 = vrot.lane.b32.xlu1 %v645_v3, %s2615_s23  ;;  %1463 = vrot.lane.b32.xlu0 %v3139_v40, %s2616_s7  ;;  %v3297_v40 = vpop.permute.xlu1 %908 }
 0x1d5   : > { %1465 = vrot.lane.b32.xlu1 %v696_v0, %s2616_s7  ;;  %996 = vrot.lane.b32.xlu0 %v649_v5, %s2615_s23 }
 0x1d9   : > { %1461 = vrot.lane.b32.xlu1 %v3136_v39, %s2616_s7  ;;  %986 = vrot.lane.b32.xlu0 %v3151_v44, %s2614_s25  ;;  %v903_v39 = vpop.permute.xlu0 %902 }
 0x1dd   : > { %988 = vrot.lane.b32.xlu1 %v3175_v48, %s2614_s25  ;;  %1549 = vperm.xlu0 %2231, %v1543_v16   ;;  %v3299_v41 = vpop.permute.xlu0 %1255 }
 0x1e1   : > { %1554 = vperm.xlu1 %2232, %v1544_v18   ;;  %1564 = vperm.xlu0 %2231, %v1546_v19   ;;  %v3303_v43 = vpop.permute.xlu0 %906 }
 0x1e5   : > { %1559 = vperm.xlu1 %2232, %v1545_v22   ;;  %1602 = vperm.xlu0 %2231, %v1592_v23  }
 0x1e9   : > { %1597 = vperm.xlu1 %2232, %v1591_v24   ;;  %1612 = vperm.xlu0 %2231, %v1594_v26  }
 0x1ed   : > { %1607 = vperm.xlu1 %2232, %v1593_v28  }
 0x1f1   : > { %1700 = vperm.xlu1 %2232, %v1697_v31  }
 0x20f   : > { %v3301_v42 = vpop.permute.xlu1 %1363 }
 0x213   : > { %v1170_v45 = vpop.permute.xlu1 %1169  ;;  %v722_v46 = vpop.permute.xlu0 %721 }
 0x214   : > { %v1179_v47 = vsel %vm1177_vm7, %v1168_v10, %v1170_v45  ;;  %v734_v50 = vsel %vm545_vm1, %v722_v46, %v3225_v58  ;;  %v912_v10 = vsel %vm910_vm10, %v3289_v34, %v903_v39  ;;  %v2248_v45 = vld [vmem:[#allocation8 + $0x20] ss:$12 sps:$4 sm:$0xff]  }
 0x215   : > { %1192 = vmatprep.subr.bf16.mxu0 %v1179_v47  ;;  %750 = vmatpush1.bf16.msra.mxu1 %v734_v50 }
 0x216   : > { %1193 = vmatpush1.bf16.msra.mxu0 %v1178_v49  ;;  %751 = vmatprep.subr.bf16.mxu1 %v737_v51 }
 0x217   : > { %v1176_v52 = vpop.permute.xlu1 %1175  ;;  %v728_v53 = vpop.permute.xlu0 %727 }
 0x218   : > { %v1181_v54 = vsel %vm1177_vm7, %v3271_v12, %v1176_v52  ;;  %v736_v56 = vsel %vm545_vm1, %v728_v53, %v3261_v7 }
 0x219   : > { %1194 = vmatprep.subr.bf16.mxu0 %v1181_v54  ;;  %752 = vmatpush1.bf16.msra.mxu1 %v736_v56 }
 0x21a   : > { %1195 = vmatpush1.bf16.msra.mxu0 %v1180_v55  ;;  %835 = vmatprep.subr.bf16.mxu1 %v822_v57 }
 0x21b   : > { %v1360_v58 = vpop.permute.xlu1 %1359  ;;  %v1362_v59 = vpop.permute.xlu0 %1361 }
 0x21c   : > { %1984 = vmatmul.mubr.msk.bf16.vlgmr.msra.gmra.mrb[0].mxu1 %vm742_vm0, %v3274_v14  ;;  %v1366_v14 = vsel %vm1365_vm11, %v3295_v38, %v3291_v36  ;;  %v1368_v18 = vsel %vm1365_vm11, %v1360_v58, %v1362_v59 }
 0x21d   : > { %1996 = vmatmul.mubr.msk.bf16.vlgmr.msra.gmra.mrb[0].mxu0 %vm742_vm0, %v3279_v15  ;;  %791 = vmatprep.mubr.bf16.mxu1 %v2605_v1  ;;  %v1369_v15 = vsel %vm1365_vm11, %v1362_v59, %v3301_v42  ;;  %v2247_v42 = vld [vmem:[#allocation8 + $0x8] ss:$12 sps:$4 sm:$0xff]  }
 0x21e   : > { %1234 = vmatprep.mubr.bf16.mxu0 %v2605_v1 }
 0x21f   : > { %v1264_v60 = vpop.permute.xlu1 %1263  ;;  %v1358_v61 = vpop.permute.xlu0 %1357 }
 0x220   : > { %v1273_v62 = vsel %vm1271_vm9, %v3285_v21, %v1264_v60  ;;  %v1367_v11 = vsel %vm1365_vm11, %v3291_v36, %v1358_v61  ;;  %v914_v21 = vsel %vm910_vm10, %v3303_v43, %v3297_v40 }
 0x221   : > { %1286 = vmatprep.subr.bf16.mxu0 %v1273_v62 }
 0x222   : > { %1287 = vmatpush1.bf16.msra.mxu0 %v1272_v63 }
 0x223   : > { %v809_v0 = vpop.permute.xlu1 %808  ;;  %v889_v3 = vpop.permute.xlu0 %888 }
 0x224   : > { %v821_v2 = vsel %vm820_vm8, %v809_v0, %v3281_v17  ;;  %1985 = vmatmul.mubr.msk.bf16.gmra.mrb[4].mxu1 %vm742_vm0, %v714_v27 }
 0x225   : > { %1997 = vmatmul.mubr.msk.bf16.gmra.mrb[4].mxu0 %vm742_vm0, %v1162_v30  ;;  %836 = vmatpush1.bf16.msra.mxu1 %v821_v2 }
 0x226   : > { %867 = vmatprep.mubr.bf16.mxu1 %v2605_v1  ;;  %837 = vmatprep.subr.bf16.mxu1 %v824_v4 }
 0x227   : > { %v1270_v5 = vpop.permute.xlu1 %1269  ;;  %1318 = vmatprep.mubr.bf16.mxu0 %v2605_v1  ;;  %v815_v6 = vpop.permute.xlu0 %814 }
 0x228   : > { %v1275_v7 = vsel %vm1271_vm9, %v1268_v35, %v1270_v5  ;;  %v823_v9 = vsel %vm820_vm8, %v815_v6, %v3287_v33 }
 0x229   : > { %1288 = vmatprep.subr.bf16.mxu0 %v1275_v7  ;;  %838 = vmatpush1.bf16.msra.mxu1 %v823_v9 }
 0x22a   : > { %1289 = vmatpush1.bf16.msra.mxu0 %v1274_v8  ;;  %925 = vmatprep.subr.bf16.mxu1 %v912_v10 }
 0x22b   : > { %v1348_v12 = vpop.permute.xlu1 %1347  ;;  %1380 = vmatprep.subr.bf16.mxu0 %v1367_v11  ;;  %v993_v13 = vpop.permute.xlu0 %992 }
 0x22c   : > { %1986 = vmatmul.mubr.msk.bf16.vlgmr.msra.gmra.mrb[0].mxu1 %vm742_vm0, %v3151_v44 }
 0x22d   : > { %1998 = vmatmul.mubr.msk.bf16.vlgmr.msra.gmra.mrb[0].mxu0 %vm742_vm0, %v3293_v37  ;;  %877 = vmatprep.mubr.bf16.mxu1 %v2605_v1 }
 0x22e   : > { %1381 = vmatpush1.bf16.msra.mxu0 %v1366_v14  ;;  %1328 = vmatprep.mubr.bf16.mxu0 %v2605_v1 }
 0x22f   : > { %v995_v16 = vpop.permute.xlu1 %994  ;;  %1382 = vmatprep.subr.bf16.mxu0 %v1369_v15  ;;  %v1458_v17 = vpop.permute.xlu0 %1457 }
 0x232   : > { %1383 = vmatpush1.bf16.msra.mxu0 %v1368_v18 }
 0x233   : > { %v899_v19 = vpop.permute.xlu1 %898  ;;  %v891_v20 = vpop.permute.xlu0 %890 }
 0x234   : > { %v911_v44 = vsel %vm910_vm10, %v899_v19, %v3289_v34  ;;  %1987 = vmatmul.mubr.msk.bf16.gmra.mrb[4].mxu1 %vm742_vm0, %v3175_v48  ;;  %v1004_v48 = vsel %vm1002_vm12, %v993_v13, %v995_v16 }
 0x235   : > { %1999 = vmatmul.mubr.msk.bf16.gmra.mrb[4].mxu0 %vm742_vm0, %v3299_v41  ;;  %926 = vmatpush1.bf16.msra.mxu1 %v911_v44 }
 0x236   : > { %957 = vmatprep.mubr.bf16.mxu1 %v2605_v1  ;;  %927 = vmatprep.subr.bf16.mxu1 %v914_v21 }
 0x237   : > { %v1456_v22 = vpop.permute.xlu1 %1455  ;;  %1412 = vmatprep.mubr.bf16.mxu0 %v2605_v1  ;;  %v905_v23 = vpop.permute.xlu0 %904 }
 0x238   : > { %v913_v24 = vsel %vm910_vm10, %v905_v23, %v3303_v43  ;;  %v1468_v30 = vsel %vm1467_vm13, %v1456_v22, %v1458_v17 }
 0x239   : > { %928 = vmatpush1.bf16.msra.mxu1 %v913_v24 }
 0x23a   : > { %1017 = vmatprep.subr.bf16.mxu1 %v1004_v48 }
 0x23b   : > { %v1001_v25 = vpop.permute.xlu1 %1000  ;;  %v1350_v26 = vpop.permute.xlu0 %1349 }
 0x23c   : > { %1988 = vmatmul.mubr.msk.bf16.vlgmr.msra.gmra.mrb[0].mxu1 %vm742_vm0, %v889_v3 }
 0x23d   : > { %2000 = vmatmul.mubr.msk.bf16.vlgmr.msra.gmra.mrb[0].mxu0 %vm742_vm0, %v1348_v12  ;;  %967 = vmatprep.mubr.bf16.mxu1 %v2605_v1 }
 0x23e   : > { %1422 = vmatprep.mubr.bf16.mxu0 %v2605_v1 }
 0x23f   : > { %v1460_v27 = vpop.permute.xlu1 %1459  ;;  %v999_v28 = vpop.permute.xlu0 %998 }
 0x240   : > { %v1469_v29 = vsel %vm1467_vm13, %v1458_v17, %v1460_v27  ;;  %v1006_v34 = vsel %vm1002_vm12, %v999_v28, %v1001_v25 }
 0x241   : > { %1482 = vmatprep.subr.bf16.mxu0 %v1469_v29 }
 0x242   : > { %1483 = vmatpush1.bf16.msra.mxu0 %v1468_v30  ;;  %v2249_v30 = vld [vmem:[#allocation11] sm:$0xff]  }
 0x243   : > { %v991_v31 = vpop.permute.xlu1 %990  ;;  %v1464_v33 = vpop.permute.xlu0 %1463 }
 0x244   : > { %v1003_v32 = vsel %vm1002_vm12, %v991_v31, %v993_v13  ;;  %1989 = vmatmul.mubr.msk.bf16.gmra.mrb[4].mxu1 %vm742_vm0, %v891_v20  ;;  %v2250_v31 = vld [vmem:[#allocation11 + $0x8] sm:$0xff]  }
 0x245   : > { %2001 = vmatmul.mubr.msk.bf16.gmra.mrb[4].mxu0 %vm742_vm0, %v1350_v26  ;;  %1018 = vmatpush1.bf16.msra.mxu1 %v1003_v32 }
 0x246   : > { %1049 = vmatprep.mubr.bf16.mxu1 %v2605_v1  ;;  %1019 = vmatprep.subr.bf16.mxu1 %v1006_v34 }
 0x247   : > { %v1466_v35 = vpop.permute.xlu1 %1465  ;;  %1514 = vmatprep.mubr.bf16.mxu0 %v2605_v1  ;;  %v997_v36 = vpop.permute.xlu0 %996 }
 0x248   : > { %v1471_v37 = vsel %vm1467_vm13, %v1464_v33, %v1466_v35  ;;  %v1005_v38 = vsel %vm1002_vm12, %v997_v36, %v999_v28 }
 0x249   : > { %1484 = vmatprep.subr.bf16.mxu0 %v1471_v37  ;;  %1020 = vmatpush1.bf16.msra.mxu1 %v1005_v38 }
 0x24b   : > { %v1462_v39 = vpop.permute.xlu1 %1461  ;;  %v987_v41 = vpop.permute.xlu0 %986 }
 0x24c   : > { %v1470_v40 = vsel %vm1467_vm13, %v1462_v39, %v1464_v33  ;;  %1990 = vmatmul.mubr.msk.bf16.vlgmr.msra.gmra.mrb[0].mxu1 %vm742_vm0, %v987_v41 }
 0x24d   : > { %1485 = vmatpush1.bf16.msra.mxu0 %v1470_v40  ;;  %1059 = vmatprep.mubr.bf16.mxu1 %v2605_v1 }
 0x24f   : > { %v989_v43 = vpop.permute.xlu1 %988 }
 0x250   : > { %2004 = vmatmul.mubr.msk.bf16.vlgmr.msra.gmra.mrb[0].mxu0 %vm742_vm0, %v2247_v42 }
 0x251   : > { %1524 = vmatprep.mubr.bf16.mxu0 %v2605_v1 }
 0x254   : > { %1991 = vmatmul.mubr.msk.bf16.gmra.mrb[4].mxu1 %vm742_vm0, %v989_v43 }
 0x255   : > { %1663 = vmatprep.mubr.bf16.mxu1 %v2605_v1 }
 0x258   : > { %2005 = vmatmul.mubr.msk.bf16.gmra.mrb[4].mxu0 %vm742_vm0, %v2248_v45 }
 0x25c   : > { %v1550_v54 = vpop.permute.xlu0 %1549 }
 0x260   : > { %v1555_v60 = vpop.permute.xlu1 %1554  ;;  %v1565_v20 = vpop.permute.xlu0 %1564 }
 0x264   : > { %v1560_v14 = vpop.permute.xlu1 %1559  ;;  %v1603_v36 = vpop.permute.xlu0 %1602 }
 0x268   : > { %v1598_v32 = vpop.permute.xlu1 %1597 }
 0x31f   : > { %v1051_v46 = vpop.f32.mrb[0].mxu1 }
 0x320   : > { %v1053_v47 = vpop.f32.mrb[1].mxu1 }
 0x321   : > { %v1055_v49 = vpop.f32.mrb[2].mxu1 }
 0x322   : > { %v1057_v50 = vpop.f32.mrb[3].mxu1 }
 0x323   : > { %v1516_v51 = vpop.f32.mrb[0].mxu0 }
 0x324   : > { %v2021_v52 = vadd.f32 %v1516_v51, %v1051_v46  ;;  %v1518_v53 = vpop.f32.mrb[1].mxu0 }
 0x325   : > { %v2022_v55 = vadd.f32 %v1518_v53, %v1053_v47  ;;  %v1520_v56 = vpop.f32.mrb[2].mxu0  ;;  %v1613_v53 = vpop.permute.xlu0 %1612 }
 0x326   : > { %v1567_v57 = vadd.f32 %v2021_v52, %v1550_v54  ;;  %v2023_v58 = vadd.f32 %v1520_v56, %v1055_v49  ;;  %v1522_v59 = vpop.f32.mrb[3].mxu0  ;;  %v1608_v49 = vpop.permute.xlu1 %1607 }
 0x327   : > { %v1568_v61 = vadd.f32 %v2022_v55, %v1550_v54  ;;  %v2024_v62 = vadd.f32 %v1522_v59, %v1057_v50  ;;  %v1061_v0 = vpop.f32.mrb[4].mxu1 }
 0x328   : > { %v1569_v63 = vadd.f32 %v2023_v58, %v1555_v60  ;;  %v1063_v3 = vpop.f32.mrb[5].mxu1  ;;  %v1575_v4 = vmax.f32 %v1567_v57, 0.0 }
 0x329   : > { %v1570_v2 = vadd.f32 %v2024_v62, %v1555_v60  ;;  %v1065_v6 = vpop.f32.mrb[6].mxu1  ;;  %v1576_v7 = vmax.f32 %v1568_v61, 0.0 }
 0x32a   : > { %v1577_v5 = vmax.f32 %v1569_v63, 0.0  ;;  %v1067_v9 = vpop.f32.mrb[7].mxu1 }
 0x32b   : > { %v1578_v8 = vmax.f32 %v1570_v2, 0.0  ;;  %v1526_v10 = vpop.f32.mrb[4].mxu0  ;;  %v1696_v2 = vld [vmem:[#allocation14] sm:$0x3] }
 0x32c   : > { %v1583_v11 = vpack.c.bf16 %v1577_v5, %v1575_v4  ;;  %v2025_v12 = vadd.f32 %v1526_v10, %v1061_v0  ;;  %v1528_v13 = vpop.f32.mrb[5].mxu0 }
 0x32d   : > { %v2026_v15 = vadd.f32 %v1528_v13, %v1063_v3  ;;  %v1530_v16 = vpop.f32.mrb[6].mxu0  ;;  %v1584_v17 = vpack.c.bf16 %v1578_v8, %v1576_v7  ;;  %v1701_v3 = vpop.permute.xlu1 %1700 }
 0x32e   : > { %v1571_v18 = vadd.f32 %v2025_v12, %v1560_v14  ;;  %v2027_v19 = vadd.f32 %v1530_v16, %v1065_v6  ;;  %v1532_v44 = vpop.f32.mrb[7].mxu0 }
 0x32f   : > { %v1572_v21 = vadd.f32 %v2026_v15, %v1560_v14  ;;  %v2028_v22 = vadd.f32 %v1532_v44, %v1067_v9  ;;  %1631 = vmatprep.subr.bf16.mxu1 %v1584_v17 }
 0x330   : > { %v1573_v23 = vadd.f32 %v2027_v19, %v1565_v20  ;;  %1632 = vmatpush1.bf16.msra.mxu1 %v1583_v11  ;;  %v1579_v48 = vmax.f32 %v1571_v18, 0.0 }
 0x331   : > { %v1574_v24 = vadd.f32 %v2028_v22, %v1565_v20  ;;  %v1580_v26 = vmax.f32 %v1572_v21, 0.0 }
 0x332   : > { %v1581_v25 = vmax.f32 %v1573_v23, 0.0 }
 0x333   : > { %v1582_v27 = vmax.f32 %v1574_v24, 0.0 }
 0x334   : > { %v1585_v28 = vpack.c.bf16 %v1581_v25, %v1579_v48 }
 0x335   : > { %v1586_v29 = vpack.c.bf16 %v1582_v27, %v1580_v26 }
 0x337   : > { %1633 = vmatprep.subr.bf16.mxu1 %v1586_v29 }
 0x338   : > { %1634 = vmatpush1.bf16.msra.mxu1 %v1585_v28 }
 0x33b   : > { %2008 = vmatmul.mubr.msk.bf16.vlgmr.msra.gmra.mrb[8].mxu1 %vm742_vm0, %v2249_v30 }
 0x33c   : > { %1673 = vmatprep.mubr.bf16.mxu1 %v2605_v1 }
 0x343   : > { %2009 = vmatmul.mubr.msk.bf16.gmra.mrb[12].mxu1 %vm742_vm0, %v2250_v31 }
 0x344   : > { %1738 = vmatprep.mubr.bf16.mxu1 %v2605_v1 }
 0x40e   : > { %v1665_v33 = vpop.f32.mrb[8].mxu1 }
 0x40f   : > { %v1666_v34 = vadd.f32 %v1665_v33, %v1598_v32  ;;  %v1667_v35 = vpop.f32.mrb[9].mxu1 }
 0x410   : > { %v1668_v37 = vadd.f32 %v1667_v35, %v1598_v32  ;;  %v1669_v38 = vpop.f32.mrb[10].mxu1 }
 0x411   : > { %v1670_v39 = vadd.f32 %v1669_v38, %v1603_v36  ;;  %v1671_v40 = vpop.f32.mrb[11].mxu1  ;;  %v1684_v42 = vmax.f32 %v1666_v34, 0.0 }
 0x412   : > { %v1672_v41 = vadd.f32 %v1671_v40, %v1603_v36  ;;  %v1685_v45 = vmax.f32 %v1668_v37, 0.0 }
 0x413   : > { %v1686_v43 = vmax.f32 %v1670_v39, 0.0 }
 0x414   : > { %v1687_v46 = vmax.f32 %v1672_v41, 0.0 }
 0x415   : > { %v1692_v47 = vpack.c.bf16 %v1686_v43, %v1684_v42 }
 0x416   : > { %v1693_v50 = vpack.c.bf16 %v1687_v46, %v1685_v45  ;;  %v1675_v51 = vpop.f32.mrb[12].mxu1 }
 0x417   : > { %v1676_v52 = vadd.f32 %v1675_v51, %v1608_v49  ;;  %v1677_v1 = vpop.f32.mrb[13].mxu1 }
 0x418   : > { %v1678_v54 = vadd.f32 %v1677_v1, %v1608_v49  ;;  %v1679_v55 = vpop.f32.mrb[14].mxu1  ;;  %1706 = vmatprep.subr.bf16.mxu1 %v1693_v50 }
 0x419   : > { %v1680_v56 = vadd.f32 %v1679_v55, %v1613_v53  ;;  %v1681_v57 = vpop.f32.mrb[15].mxu1  ;;  %1707 = vmatpush1.bf16.msra.mxu1 %v1692_v47  ;;  %v1688_v59 = vmax.f32 %v1676_v52, 0.0 }
 0x41a   : > { %v1682_v58 = vadd.f32 %v1681_v57, %v1613_v53  ;;  %v1689_v61 = vmax.f32 %v1678_v54, 0.0 }
 0x41b   : > { %v1690_v60 = vmax.f32 %v1680_v56, 0.0 }
 0x41c   : > { %v1691_v62 = vmax.f32 %v1682_v58, 0.0 }
 0x41d   : > { %v1694_v63 = vpack.c.bf16 %v1690_v60, %v1688_v59 }
 0x41e   : > { %v1695_v0 = vpack.c.bf16 %v1691_v62, %v1689_v61 }
 0x420   : > { %1708 = vmatprep.subr.bf16.mxu1 %v1695_v0 }
 0x421   : > { %1709 = vmatpush1.bf16.msra.mxu1 %v1694_v63 }
 0x424   : > { %2010 = vmatmul.mubr.msk.bf16.vlgmr.msra.gmra.mrb[16].mxu1 %vm742_vm0, %v1696_v2 }
 0x4f7   : > { %v1740_v4 = vpop.f32.mrb[16].mxu1 }
 0x4f8   : > { %v1741_v5 = vadd.f32 %v1740_v4, %v1701_v3  ;;  %v1742_v6 = vpop.f32.mrb[17].mxu1 }
 0x4f9   : > { %v1743_v7 = vadd.f32 %v1742_v6, %v1701_v3  ;;  %v1744_v8 = vpop.f32.mrb[18].mxu1 }
 0x4fa   : > { %v2011_v9 = vmul.f32 -1.442695, %v1741_v5  ;;  %v1745_v10 = vpop.f32.mrb[19].mxu1 }
 0x4fb   : > { %v2012_v11 = vmul.f32 -1.442695, %v1743_v7 }
 0x4fc   : > { %2251 = vpow2.f32 %v2011_v9 }
 0x4fd   : > { %2253 = vpow2.f32 %v2012_v11 }
 0x506   : > { %v2252_v12 = vpop.eup %2251 }
 0x507   : > { %v2254_v13 = vpop.eup %2253  ;;  %v1753_v14 = vadd.f32 1.0, %v2252_v12 }
 0x508   : > { %v1754_v15 = vadd.f32 1.0, %v2254_v13 }
 0x509   : > { %2255 = vrcp.f32 %v1753_v14 }
 0x50a   : > { %2257 = vrcp.f32 %v1754_v15 }
 0x513   : > { %v2256_v16 = vpop.eup %2255 }
 0x514   : > { %v2258_v17 = vpop.eup %2257 }
 0x515   : > { %v1761_v18 = vcombine.low %v2256_v16, %v2258_v17 }
 0x517   : > { %1763 = vst [vmem:[%s468_s3] sm:$0x77] %v1761_v18 }
 0x518   : > { %2500 = shalt.err (!%p2497_p12)
}
 0x519   : > { %s2501_s2 = scalar_lea.hbm %s3400_s18, 128  ;;  %s2505_s0 = scalar_lea.hbm %s3518_s12, 256 }
 0x51a   : > { %p2502_p8 = scmp.ne.s32.totalorder %s3400_s18, %s2501_s2  ;;  %p2506_p6 = scmp.lt.u32.totalorder %s3400_s18, %s3518_s12 }
 0x51b   : > { %p2507_p2 = scmp.lt.u32.totalorder %s2505_s0, %s2501_s2  ;;  %p2509_p4 = scmp.lt.u32.totalorder %s2501_s2, %s3400_s18 }
 0x51c   : > { %p2503_p1 = pnand %p2502_p8, %p3519_p9 }
 0x51d   : > { %p2508_p13 = por %p2507_p2, %p2506_p6 }
 0x51e   : > { %p2504_p3 = pneg %p2503_p1 }
 0x51f   : > { %p2510_p0 = por %p2509_p4, %p2508_p13 }
 0x521   : > { %p2511_p7 = pnand %p2510_p0, %p2504_p3 }
 0x523   : > { %2514 = shalt.err (!%p2511_p7)
}
 0x524   : > { %2113 = dma.vmem_to_hbm [thread:$0]  (%p3519_p9), %s3402_s19, 128, %s3400_s18, %s1765_s11  }
 0x525 PF: > { %s1793_s23 = sand.u32 1, %s2569_s27   ;;  %p3520_p5 = scmp.ne.s32.totalorder %s3487_s20, 0 }
 0x526   : > { %p3521_p11 = scmp.ge.s32.totalorder %s2589_s10, 2  ;;  %s1794_s7 = scalar_lea.sflag [#allocation5], %s1793_s23 }
 0x528   : > { %p2142_p10 = pnand %p3521_p11, %p3520_p5 }
 0x52a   : > { %2564 = dma.done.wait (!%p2142_p10), %s1794_s7, 128  }
 0x52b   : > { %2566 = vsyncadd (!%p2142_p10), %s1794_s7, 4294967168  ;;  %s30_s10 = sadd.s32 1, %s2589_s10   ;;  %s3522_s27 = smov %s2573_s28 }
 0x52c   : > { %p27_p12 = scmp.ge.s32.totalorder %s30_s10, 4   ;;  %s3523_s28 = smov %s2577_s29 }
 0x52d   : > { %s3524_s29 = smov %s2891_s17  ;;  %s3525_s30 = smov %s2585_s9 }
 0x52e   : > { %s3526_s9 = smov %s3528_s8  ;;  %29 = sbr.rel (!%p27_p12) target bundleno = 20 (0x14), region = 134 }
 0x535   :  { %1799 = vsyncpa [#allocation4], 1 }
 0x536   :  { %1801 = vsyncpa [#allocation4 + $0x1], 1 }
 0x537   :  { %1802 = vsyncpa [#allocation7], 1 }
 0x538   :  { %1804 = vsyncpa [#allocation7 + $0x1], 1 }
 0x539   :  { %1805 = vsyncpa [#allocation10], 1 }
 0x53a   :  { %1806 = vsyncpa [#allocation13], 1 }
 0x53b   :  { %1807 = vsyncpa [#allocation16], 1 }
 0x53c   :  { %1808 = vsyncpa [#allocation5], 1 }
 0x53d   :  { %1810 = vsyncpa [#allocation5 + $0x1], 1 }

</bundles_post_ra>
